<compile_context>
chip_gen: v7x
topology: tpu7x:2x2x1
jax: 0.10.0
libtpu: 0.0.40
codegen_flags: <defaults>
</compile_context>

<pallas_src>
import functools
import math

import jax
import jax.numpy as jnp
from jax import lax
from jax.experimental import pallas as pl
from jax.experimental.pallas import tpu as pltpu


def bwlstm2_kernel(z_ref, x_ref,
                   w_in_ref, b_in_ref, w_rec_ref,
                   fc2_w1, fc2_b1, fc2_w2, fc2_b2,
                   gpx_w1, gpx_b1, ln_g, ln_b, gpx_w2, gpx_b2,
                   out_ref,
                   xp_scr, h2_scr, *, batch):
    SB = z_ref.shape[0]
    B = batch
    S = SB // B
    H = h2_scr.shape[1]
    G = 3 * H                       # packed per-gate group width: [layer0|layer1|layer2]

    # ---- hoisted input-side projection for ALL timesteps (K=3 -> VPU FMAs) ----
    # Operands bf16-rounded (matches MXU numerics used everywhere else).
    zv = z_ref[...].astype(jnp.bfloat16).astype(jnp.float32)          # (S*B, 3)
    w_in = w_in_ref[...]                                              # (3, 12H), bf16-exact f32
    xp_scr[...] = (b_in_ref[...]
                   + zv[:, 0:1] * w_in[0:1, :]
                   + zv[:, 1:2] * w_in[1:2, :]
                   + zv[:, 2:3] * w_in[2:3, :])                       # (S*B, 12H)

    # ---- 3-layer LSTM as a wavefront (S+2 waves, statically unrolled) --------
    # Packed state [h0|h1|h2], [c0|c1|c2] carried as values (registers, no VMEM
    # round-trip on the serial chain).  One fused bf16 matmul per wave gives all
    # three layers' recurrent + inter-layer-input gate contributions.
    w_rec = w_rec_ref[...]                                            # (3H, 12H) bf16, hoisted
    h = jnp.zeros((B, G), jnp.float32)
    c = jnp.zeros((B, G), jnp.float32)

    for w in range(S + 2):
        t0 = min(w, S - 1)          # layer-0 timestep (clamped; edge-wave garbage is discarded)
        gates = xp_scr[t0 * B:(t0 + 1) * B, :] + jnp.dot(
            h.astype(jnp.bfloat16), w_rec, preferred_element_type=jnp.float32)  # (B, 12H)

        # 2 full-width EUP passes; contiguous (B,3H) gate blocks [i|f|o|g].
        sg = jax.nn.sigmoid(gates[:, 0:3 * G])
        gg = jnp.tanh(gates[:, 3 * G:4 * G])
        c_new = sg[:, G:2 * G] * c + sg[:, 0:G] * gg
        h_new = sg[:, 2 * G:3 * G] * jnp.tanh(c_new)

        # Static wavefront boundary handling: only layers whose timestep is in
        # [0, S) commit state this wave (always a contiguous column range).
        a0, a1, a2 = (w < S), (1 <= w <= S), (2 <= w <= S + 1)
        lo = 0 if a0 else (H if a1 else 2 * H)
        hi = G if a2 else (2 * H if a1 else H)
        if lo == 0 and hi == G:     # interior waves: full update, no masking
            h, c = h_new, c_new
        else:                       # 4 edge waves: masked update (trace-time constant mask)
            col = lax.broadcasted_iota(jnp.int32, (B, G), 1)
            keep = (col >= lo) & (col < hi)
            h = jnp.where(keep, h_new, h)
            c = jnp.where(keep, c_new, c)
        if a2:                      # layer-2 output for timestep t = w-2
            t2 = w - 2
            h2_scr[t2 * B:(t2 + 1) * B, :] = h_new[:, 2 * H:3 * H]

    # ---- fc2: Linear(H,F) -> LeakyReLU(0.01) -> Linear(F,1) ------------------
    h1v = jnp.dot(h2_scr[...].astype(jnp.bfloat16), fc2_w1[...],
                  preferred_element_type=jnp.float32) + fc2_b1[...]   # (S*B, F)
    h1v = jnp.where(h1v > 0, h1v, 0.01 * h1v)
    # N=1 projection as VPU broadcast-mul + lane reduce (fc2_w2 is a (1,F) row).
    g2 = jnp.sum(h1v * fc2_w2[...], axis=-1, keepdims=True) + fc2_b2[...]      # (S*B, 1)

    # ---- g_plus_x: Linear(2,F)([g,x]) -> LayerNorm(F) -> ReLU -> Linear(F,1) --
    w1 = gpx_w1[...]                                                  # (2, F)
    # cat([g, x], -1) @ w1  ==  g * w1[0] + x * w1[1]  (no in-kernel concat)
    u = g2 * w1[0:1, :] + x_ref[...] * w1[1:2, :] + gpx_b1[...]       # (S*B, F)
    mu = jnp.mean(u, axis=-1, keepdims=True)
    var = jnp.mean((u - mu) ** 2, axis=-1, keepdims=True)
    un = (u - mu) * lax.rsqrt(var + 1e-5) * ln_g[...] + ln_b[...]
    un = jnp.maximum(un, 0.0)
    ggx = jnp.sum(un * gpx_w2[...], axis=-1, keepdims=True) + gpx_b2[...]

    # Single packed output (one output DMA); split in the wrapper.
    out_ref[:, 0:1] = g2
    out_ref[:, 1:2] = ggx


def init_params(key, *, hidden=32, fc=16, num_layers=3, input_size=3):
    keys = iter(jax.random.split(key, 64))

    def unif(shape, bound):
        return jax.random.uniform(next(keys), shape, jnp.float32, -bound, bound)

    k_h = 1.0 / math.sqrt(hidden)
    lstm = []
    in_dim = input_size
    for _ in range(num_layers):
        w_ih = unif((in_dim, 4 * hidden), k_h)                 # fused gate layout [i,f,g,o]
        w_hh = unif((hidden, 4 * hidden), k_h)
        b = unif((1, 4 * hidden), k_h) + unif((1, 4 * hidden), k_h)  # b_ih + b_hh
        lstm.append((w_ih, w_hh, b))
        in_dim = hidden

    params = {
        "lstm": lstm,
        "fc2_w1": unif((hidden, fc), 1.0 / math.sqrt(hidden)),
        "fc2_b1": unif((1, fc), 1.0 / math.sqrt(hidden)),
        "fc2_w2": unif((1, fc), 1.0 / math.sqrt(fc)),          # row vector of Linear(F,1)
        "fc2_b2": unif((1, 1), 1.0 / math.sqrt(fc)),
        "gpx_w1": unif((2, fc), 1.0 / math.sqrt(2.0)),
        "gpx_b1": unif((1, fc), 1.0 / math.sqrt(2.0)),
        "ln_g": jnp.ones((1, fc), jnp.float32),
        "ln_b": jnp.zeros((1, fc), jnp.float32),
        "gpx_w2": unif((1, fc), 1.0 / math.sqrt(fc)),          # row vector of Linear(F,1)
        "gpx_b2": unif((1, 1), 1.0 / math.sqrt(fc)),
    }
    return params


def _assemble_fused_weights(params):
    """Build the wavefront block weights (host/XLA side, free).

    Column layout of the fused 12H gate axis: [i | f | o | g], each group 3H
    wide and internally packed [layer0 | layer1 | layer2].
    Row layout of w_rec matches the packed state [h0 | h1 | h2].
    """
    (w_ih0, w_hh0, b0), (w_ih1, w_hh1, b1), (w_ih2, w_hh2, b2) = params["lstm"]
    H = w_hh0.shape[0]
    zH = jnp.zeros((H, H), jnp.float32)
    z3 = jnp.zeros((w_ih0.shape[0], H), jnp.float32)

    def gc(w, g):                                   # gate columns, source order [i,f,g,o]
        return w[:, g * H:(g + 1) * H]

    order = (0, 1, 3, 2)                            # target blocks [i, f, o, g]
    w_in_cols, b_cols, w_rec_cols = [], [], []
    for g in order:
        w_in_cols += [gc(w_ih0, g), z3, z3]
        b_cols += [gc(b0, g), gc(b1, g), gc(b2, g)]
        w_rec_cols += [
            jnp.concatenate([gc(w_hh0, g), zH, zH], axis=0),             # -> layer0 gates
            jnp.concatenate([gc(w_ih1, g), gc(w_hh1, g), zH], axis=0),   # -> layer1 gates
            jnp.concatenate([zH, gc(w_ih2, g), gc(w_hh2, g)], axis=0),   # -> layer2 gates
        ]
    w_in = jnp.concatenate(w_in_cols, axis=1)       # (3, 12H)
    b_in = jnp.concatenate(b_cols, axis=1)          # (1, 12H)
    w_rec = jnp.concatenate(w_rec_cols, axis=1)     # (3H, 12H)
    return w_in, b_in, w_rec


def bwlstm2_forward(x, z, params):
    """x: (B, S, 1)  z: (B, S, 3)  ->  dict(dz_dt, g, g_gamma_x) (batch-first)."""
    if x.shape[-1] > 1:
        x = x[..., 1:2]
    B, S, _ = z.shape
    H = params["lstm"][0][1].shape[0]                          # w_hh is (H, 4H)

    # dz/dt in the wrapper (torch.gradient dim=1, unit spacing, edge_order=1):
    # independent elementwise work that XLA fuses with the transposes for free.
    dz = jnp.concatenate([z[:, 1:2] - z[:, 0:1],
                          (z[:, 2:] - z[:, :-2]) * 0.5,
                          z[:, -1:] - z[:, -2:-1]], axis=1)

    # Time-major flattening: kernel row = t*B + b.
    z_flat = jnp.transpose(z, (1, 0, 2)).reshape(S * B, 3)
    x_flat = jnp.transpose(x, (1, 0, 2)).reshape(S * B, 1)

    w_in, b_in, w_rec = _assemble_fused_weights(params)
    # MXU-operand weights in bf16 (f32 accumulation in-kernel); the K=3 input
    # projection stays on the VPU, so its weights are just bf16-rounded f32.
    w_in = w_in.astype(jnp.bfloat16).astype(jnp.float32)
    w_rec = w_rec.astype(jnp.bfloat16)
    fc2_w1 = params["fc2_w1"].astype(jnp.bfloat16)

    inputs = [z_flat, x_flat, w_in, b_in, w_rec,
              fc2_w1, params["fc2_b1"], params["fc2_w2"], params["fc2_b2"],
              params["gpx_w1"], params["gpx_b1"], params["ln_g"], params["ln_b"],
              params["gpx_w2"], params["gpx_b2"]]

    vmem = pl.BlockSpec(memory_space=pltpu.MemorySpace.VMEM)
    packed = pl.pallas_call(
        functools.partial(bwlstm2_kernel, batch=B),
        out_shape=jax.ShapeDtypeStruct((S * B, 2), jnp.float32),
        in_specs=[vmem] * len(inputs),
        out_specs=vmem,
        scratch_shapes=[pltpu.VMEM((S * B, 12 * H), jnp.float32),   # hoisted input projection
                        pltpu.VMEM((S * B, H), jnp.float32)],       # layer-2 outputs
        # ~110 KiB live; explicit limit is the v7x VMEM guard from the review.
        compiler_params=pltpu.CompilerParams(vmem_limit_bytes=16 * 1024 * 1024),
    )(*inputs)

    packed = jnp.transpose(packed.reshape(S, B, 2), (1, 0, 2))     # (B, S, 2)
    return {"dz_dt": dz, "g": packed[..., 0:1], "g_gamma_x": packed[..., 1:2]}


def reference_forward(x, z, params):
    """Pure-JAX reference; matmul operands bf16-rounded (f32 accumulation) to
    mirror the kernel's (and the TPU MXU's) numerics."""
    if x.shape[-1] > 1:
        x = x[..., 1:2]
    B, S, _ = z.shape
    dz = jnp.concatenate([z[:, 1:2] - z[:, 0:1],
                          (z[:, 2:] - z[:, :-2]) * 0.5,
                          z[:, -1:] - z[:, -2:-1]], axis=1)

    bf = lambda a: a.astype(jnp.bfloat16)
    inp = z
    for (w_ih, w_hh, b) in params["lstm"]:
        H = w_hh.shape[0]
        h = jnp.zeros((B, H), jnp.float32)
        c = jnp.zeros((B, H), jnp.float32)
        outs = []
        for t in range(S):
            gates = (jnp.dot(bf(inp[:, t, :]), bf(w_ih), preferred_element_type=jnp.float32)
                     + jnp.dot(bf(h), bf(w_hh), preferred_element_type=jnp.float32) + b)
            i_g = jax.nn.sigmoid(gates[:, 0:H])
            f_g = jax.nn.sigmoid(gates[:, H:2 * H])
            g_g = jnp.tanh(gates[:, 2 * H:3 * H])
            o_g = jax.nn.sigmoid(gates[:, 3 * H:4 * H])
            c = f_g * c + i_g * g_g
            h = o_g * jnp.tanh(c)
            outs.append(h)
        inp = jnp.stack(outs, axis=1)

    Hn = inp.shape[-1]
    h1 = jnp.dot(bf(inp.reshape(B * S, Hn)), bf(params["fc2_w1"]),
                 preferred_element_type=jnp.float32).reshape(B, S, -1) + params["fc2_b1"]
    h1 = jnp.where(h1 > 0, h1, 0.01 * h1)
    g = jnp.sum(h1 * params["fc2_w2"], axis=-1, keepdims=True) + params["fc2_b2"]

    w1 = params["gpx_w1"]
    u = g * w1[0:1, :] + x * w1[1:2, :] + params["gpx_b1"]   # == cat([g,x],-1) @ w1
    mu = u.mean(-1, keepdims=True)
    var = ((u - mu) ** 2).mean(-1, keepdims=True)
    un = (u - mu) * lax.rsqrt(var + 1e-5) * params["ln_g"] + params["ln_b"]
    un = jnp.maximum(un, 0.0)
    ggx = jnp.sum(un * params["gpx_w2"], axis=-1, keepdims=True) + params["gpx_b2"]
    return {"dz_dt": dz, "g": g, "g_gamma_x": ggx}


if __name__ == "__main__":
    B, S, H, F = 2, 8, 32, 16

    key = jax.random.PRNGKey(0)
    k_p, k_x, k_z = jax.random.split(key, 3)
    params = init_params(k_p, hidden=H, fc=F, num_layers=3, input_size=3)

    x = jax.random.normal(k_x, (B, S, 1), jnp.float32)
    z = jax.random.normal(k_z, (B, S, 3), jnp.float32)

    out = bwlstm2_forward(x, z, params)
    jax.block_until_ready(out)

    ref = reference_forward(x, z, params)
    # Tolerance tightened 4x vs. previous rev; residual slack covers bf16
    # operand-rounding boundary effects and EUP-vs-XLA transcendental deltas
    # (a real layout/indexing bug produces O(1e-1) errors).
    for name in ("dz_dt", "g", "g_gamma_x"):
        assert out[name].shape == ref[name].shape, name
        assert jnp.allclose(out[name], ref[name], atol=5e-3, rtol=5e-3), name

    print("KERNEL_OK")
</pallas_src>

<mosaic_0001>
module attributes {stable_mosaic.version = 11 : i64} {
  func.func @bwlstm2_kernel(%arg0: memref<16x3xf32, #tpu.memory_space<vmem>>, %arg1: memref<16x1xf32, #tpu.memory_space<vmem>>, %arg2: memref<3x384xf32, #tpu.memory_space<vmem>>, %arg3: memref<1x384xf32, #tpu.memory_space<vmem>>, %arg4: memref<96x384xbf16, #tpu.memory_space<vmem>>, %arg5: memref<32x16xbf16, #tpu.memory_space<vmem>>, %arg6: memref<1x16xf32, #tpu.memory_space<vmem>>, %arg7: memref<1x16xf32, #tpu.memory_space<vmem>>, %arg8: memref<1x1xf32, #tpu.memory_space<vmem>>, %arg9: memref<2x16xf32, #tpu.memory_space<vmem>>, %arg10: memref<1x16xf32, #tpu.memory_space<vmem>>, %arg11: memref<1x16xf32, #tpu.memory_space<vmem>>, %arg12: memref<1x16xf32, #tpu.memory_space<vmem>>, %arg13: memref<1x16xf32, #tpu.memory_space<vmem>>, %arg14: memref<1x1xf32, #tpu.memory_space<vmem>>, %arg15: memref<16x2xf32, #tpu.memory_space<vmem>>, %arg16: memref<16x384xf32, #tpu.memory_space<vmem>>, %arg17: memref<16x32xf32, #tpu.memory_space<vmem>>) attributes {dimension_semantics = [], scalar_prefetch = 0 : i64, scratch_operands = 2 : i64, tpu.core_type = #tpu.core_type<tc>} {
    %c0 = arith.constant 0 : index
    %c0_0 = arith.constant 0 : index
    %0 = vector.load %arg0[%c0, %c0_0] : memref<16x3xf32, #tpu.memory_space<vmem>>, vector<16x3xf32>
    %1 = arith.truncf %0 : vector<16x3xf32> to vector<16x3xbf16>
    %2 = arith.extf %1 : vector<16x3xbf16> to vector<16x3xf32>
    %c0_1 = arith.constant 0 : index
    %c0_2 = arith.constant 0 : index
    %3 = vector.load %arg2[%c0_1, %c0_2] : memref<3x384xf32, #tpu.memory_space<vmem>>, vector<3x384xf32>
    %c0_3 = arith.constant 0 : index
    %c0_4 = arith.constant 0 : index
    %4 = vector.load %arg3[%c0_3, %c0_4] : memref<1x384xf32, #tpu.memory_space<vmem>>, vector<1x384xf32>
    %5 = vector.extract_strided_slice %2 {offsets = [0, 0], sizes = [16, 1], strides = [1, 1]} : vector<16x3xf32> to vector<16x1xf32>
    %6 = vector.extract_strided_slice %3 {offsets = [0, 0], sizes = [1, 384], strides = [1, 1]} : vector<3x384xf32> to vector<1x384xf32>
    %7 = vector.broadcast %5 : vector<16x1xf32> to vector<16x384xf32>
    %8 = vector.broadcast %6 : vector<1x384xf32> to vector<16x384xf32>
    %9 = arith.mulf %7, %8 : vector<16x384xf32>
    %10 = vector.broadcast %4 : vector<1x384xf32> to vector<16x384xf32>
    %11 = arith.addf %10, %9 : vector<16x384xf32>
    %12 = vector.extract_strided_slice %2 {offsets = [0, 1], sizes = [16, 1], strides = [1, 1]} : vector<16x3xf32> to vector<16x1xf32>
    %13 = vector.extract_strided_slice %3 {offsets = [1, 0], sizes = [1, 384], strides = [1, 1]} : vector<3x384xf32> to vector<1x384xf32>
    %14 = vector.broadcast %12 : vector<16x1xf32> to vector<16x384xf32>
    %15 = vector.broadcast %13 : vector<1x384xf32> to vector<16x384xf32>
    %16 = arith.mulf %14, %15 : vector<16x384xf32>
    %17 = arith.addf %11, %16 : vector<16x384xf32>
    %18 = vector.extract_strided_slice %2 {offsets = [0, 2], sizes = [16, 1], strides = [1, 1]} : vector<16x3xf32> to vector<16x1xf32>
    %19 = vector.extract_strided_slice %3 {offsets = [2, 0], sizes = [1, 384], strides = [1, 1]} : vector<3x384xf32> to vector<1x384xf32>
    %20 = vector.broadcast %18 : vector<16x1xf32> to vector<16x384xf32>
    %21 = vector.broadcast %19 : vector<1x384xf32> to vector<16x384xf32>
    %22 = arith.mulf %20, %21 : vector<16x384xf32>
    %23 = arith.addf %17, %22 : vector<16x384xf32>
    %c0_5 = arith.constant 0 : index
    %c0_6 = arith.constant 0 : index
    %24 = vector.load %arg16[%c0_5, %c0_6] : memref<16x384xf32, #tpu.memory_space<vmem>>, vector<16x384xf32>
    tpu.vector_store %arg16[%c0_5, %c0_6], %23 {strides = array<i32>} : memref<16x384xf32, #tpu.memory_space<vmem>>, vector<16x384xf32>,
    %c0_7 = arith.constant 0 : index
    %c0_8 = arith.constant 0 : index
    %25 = vector.load %arg4[%c0_7, %c0_8] : memref<96x384xbf16, #tpu.memory_space<vmem>>, vector<96x384xbf16>
    %cst = arith.constant 0.000000e+00 : f32
    %26 = vector.broadcast %cst : f32 to vector<2x96xf32>
    %cst_9 = arith.constant 0.000000e+00 : f32
    %27 = vector.broadcast %cst_9 : f32 to vector<2x96xf32>
    %c0_10 = arith.constant 0 : index
    %c0_11 = arith.constant 0 : index
    %28 = vector.load %arg16[%c0_10, %c0_11] : memref<16x384xf32, #tpu.memory_space<vmem>>, vector<2x384xf32>
    %29 = arith.truncf %26 : vector<2x96xf32> to vector<2x96xbf16>
    %cst_12 = arith.constant dense<0.000000e+00> : vector<2x384xf32>
    %30 = tpu.matmul %29, %25, %cst_12 {dimension_numbers = #tpu.dot_dimension_numbers<[1], [0], [0], [1], [0, 0, 1, 1], [], []>} : vector<2x96xbf16>, vector<96x384xbf16>, vector<2x384xf32> -> vector<2x384xf32>
    %31 = arith.addf %28, %30 : vector<2x384xf32>
    %32 = vector.extract_strided_slice %31 {offsets = [0, 0], sizes = [2, 288], strides = [1, 1]} : vector<2x384xf32> to vector<2x288xf32>
    %33 = arith.negf %32 : vector<2x288xf32>
    %34 = math.exp %33 : vector<2x288xf32>
    %cst_13 = arith.constant 1.000000e+00 : f32
    %35 = vector.broadcast %cst_13 : f32 to vector<2x288xf32>
    %36 = arith.addf %35, %34 : vector<2x288xf32>
    %37 = arith.divf %35, %36 : vector<2x288xf32>
    %38 = vector.extract_strided_slice %31 {offsets = [0, 288], sizes = [2, 96], strides = [1, 1]} : vector<2x384xf32> to vector<2x96xf32>
    %39 = math.tanh %38 : vector<2x96xf32>
    %40 = vector.extract_strided_slice %37 {offsets = [0, 96], sizes = [2, 96], strides = [1, 1]} : vector<2x288xf32> to vector<2x96xf32>
    %41 = arith.mulf %40, %27 : vector<2x96xf32>
    %42 = vector.extract_strided_slice %37 {offsets = [0, 0], sizes = [2, 96], strides = [1, 1]} : vector<2x288xf32> to vector<2x96xf32>
    %43 = arith.mulf %42, %39 : vector<2x96xf32>
    %44 = arith.addf %41, %43 : vector<2x96xf32>
    %45 = vector.extract_strided_slice %37 {offsets = [0, 192], sizes = [2, 96], strides = [1, 1]} : vector<2x288xf32> to vector<2x96xf32>
    %46 = math.tanh %44 : vector<2x96xf32>
    %47 = arith.mulf %45, %46 : vector<2x96xf32>
    %48 = tpu.iota {dimensions = array<i32: 1>} : vector<2x96xi32>
    %c0_i32 = arith.constant 0 : i32
    %49 = vector.broadcast %c0_i32 : i32 to vector<2x96xi32>
    %50 = arith.cmpi sge, %48, %49 : vector<2x96xi32>
    %c32_i32 = arith.constant 32 : i32
    %51 = vector.broadcast %c32_i32 : i32 to vector<2x96xi32>
    %52 = arith.cmpi slt, %48, %51 : vector<2x96xi32>
    %53 = arith.andi %50, %52 : vector<2x96xi1>
    %54 = arith.select %53, %47, %26 : vector<2x96xi1>, vector<2x96xf32>
    %55 = arith.select %53, %44, %27 : vector<2x96xi1>, vector<2x96xf32>
    %c2 = arith.constant 2 : index
    %c0_14 = arith.constant 0 : index
    %56 = vector.load %arg16[%c2, %c0_14] : memref<16x384xf32, #tpu.memory_space<vmem>>, vector<2x384xf32>
    %57 = arith.truncf %54 : vector<2x96xf32> to vector<2x96xbf16>
    %cst_15 = arith.constant dense<0.000000e+00> : vector<2x384xf32>
    %58 = tpu.matmul %57, %25, %cst_15 {dimension_numbers = #tpu.dot_dimension_numbers<[1], [0], [0], [1], [0, 0, 1, 1], [], []>} : vector<2x96xbf16>, vector<96x384xbf16>, vector<2x384xf32> -> vector<2x384xf32>
    %59 = arith.addf %56, %58 : vector<2x384xf32>
    %60 = vector.extract_strided_slice %59 {offsets = [0, 0], sizes = [2, 288], strides = [1, 1]} : vector<2x384xf32> to vector<2x288xf32>
    %61 = arith.negf %60 : vector<2x288xf32>
    %62 = math.exp %61 : vector<2x288xf32>
    %cst_16 = arith.constant 1.000000e+00 : f32
    %63 = vector.broadcast %cst_16 : f32 to vector<2x288xf32>
    %64 = arith.addf %63, %62 : vector<2x288xf32>
    %65 = arith.divf %63, %64 : vector<2x288xf32>
    %66 = vector.extract_strided_slice %59 {offsets = [0, 288], sizes = [2, 96], strides = [1, 1]} : vector<2x384xf32> to vector<2x96xf32>
    %67 = math.tanh %66 : vector<2x96xf32>
    %68 = vector.extract_strided_slice %65 {offsets = [0, 96], sizes = [2, 96], strides = [1, 1]} : vector<2x288xf32> to vector<2x96xf32>
    %69 = arith.mulf %68, %55 : vector<2x96xf32>
    %70 = vector.extract_strided_slice %65 {offsets = [0, 0], sizes = [2, 96], strides = [1, 1]} : vector<2x288xf32> to vector<2x96xf32>
    %71 = arith.mulf %70, %67 : vector<2x96xf32>
    %72 = arith.addf %69, %71 : vector<2x96xf32>
    %73 = vector.extract_strided_slice %65 {offsets = [0, 192], sizes = [2, 96], strides = [1, 1]} : vector<2x288xf32> to vector<2x96xf32>
    %74 = math.tanh %72 : vector<2x96xf32>
    %75 = arith.mulf %73, %74 : vector<2x96xf32>
    %76 = tpu.iota {dimensions = array<i32: 1>} : vector<2x96xi32>
    %c0_i32_17 = arith.constant 0 : i32
    %77 = vector.broadcast %c0_i32_17 : i32 to vector<2x96xi32>
    %78 = arith.cmpi sge, %76, %77 : vector<2x96xi32>
    %c64_i32 = arith.constant 64 : i32
    %79 = vector.broadcast %c64_i32 : i32 to vector<2x96xi32>
    %80 = arith.cmpi slt, %76, %79 : vector<2x96xi32>
    %81 = arith.andi %78, %80 : vector<2x96xi1>
    %82 = arith.select %81, %75, %54 : vector<2x96xi1>, vector<2x96xf32>
    %83 = arith.select %81, %72, %55 : vector<2x96xi1>, vector<2x96xf32>
    %c4 = arith.constant 4 : index
    %c0_18 = arith.constant 0 : index
    %84 = vector.load %arg16[%c4, %c0_18] : memref<16x384xf32, #tpu.memory_space<vmem>>, vector<2x384xf32>
    %85 = arith.truncf %82 : vector<2x96xf32> to vector<2x96xbf16>
    %cst_19 = arith.constant dense<0.000000e+00> : vector<2x384xf32>
    %86 = tpu.matmul %85, %25, %cst_19 {dimension_numbers = #tpu.dot_dimension_numbers<[1], [0], [0], [1], [0, 0, 1, 1], [], []>} : vector<2x96xbf16>, vector<96x384xbf16>, vector<2x384xf32> -> vector<2x384xf32>
    %87 = arith.addf %84, %86 : vector<2x384xf32>
    %88 = vector.extract_strided_slice %87 {offsets = [0, 0], sizes = [2, 288], strides = [1, 1]} : vector<2x384xf32> to vector<2x288xf32>
    %89 = arith.negf %88 : vector<2x288xf32>
    %90 = math.exp %89 : vector<2x288xf32>
    %cst_20 = arith.constant 1.000000e+00 : f32
    %91 = vector.broadcast %cst_20 : f32 to vector<2x288xf32>
    %92 = arith.addf %91, %90 : vector<2x288xf32>
    %93 = arith.divf %91, %92 : vector<2x288xf32>
    %94 = vector.extract_strided_slice %87 {offsets = [0, 288], sizes = [2, 96], strides = [1, 1]} : vector<2x384xf32> to vector<2x96xf32>
    %95 = math.tanh %94 : vector<2x96xf32>
    %96 = vector.extract_strided_slice %93 {offsets = [0, 96], sizes = [2, 96], strides = [1, 1]} : vector<2x288xf32> to vector<2x96xf32>
    %97 = arith.mulf %96, %83 : vector<2x96xf32>
    %98 = vector.extract_strided_slice %93 {offsets = [0, 0], sizes = [2, 96], strides = [1, 1]} : vector<2x288xf32> to vector<2x96xf32>
    %99 = arith.mulf %98, %95 : vector<2x96xf32>
    %100 = arith.addf %97, %99 : vector<2x96xf32>
    %101 = vector.extract_strided_slice %93 {offsets = [0, 192], sizes = [2, 96], strides = [1, 1]} : vector<2x288xf32> to vector<2x96xf32>
    %102 = math.tanh %100 : vector<2x96xf32>
    %103 = arith.mulf %101, %102 : vector<2x96xf32>
    %104 = vector.extract_strided_slice %103 {offsets = [0, 64], sizes = [2, 32], strides = [1, 1]} : vector<2x96xf32> to vector<2x32xf32>
    %c0_21 = arith.constant 0 : index
    %c0_22 = arith.constant 0 : index
    %105 = vector.load %arg17[%c0_21, %c0_22] : memref<16x32xf32, #tpu.memory_space<vmem>>, vector<2x32xf32>
    tpu.vector_store %arg17[%c0_21, %c0_22], %104 {strides = array<i32>} : memref<16x32xf32, #tpu.memory_space<vmem>>, vector<2x32xf32>,
    %c6 = arith.constant 6 : index
    %c0_23 = arith.constant 0 : index
    %106 = vector.load %arg16[%c6, %c0_23] : memref<16x384xf32, #tpu.memory_space<vmem>>, vector<2x384xf32>
    %107 = arith.truncf %103 : vector<2x96xf32> to vector<2x96xbf16>
    %cst_24 = arith.constant dense<0.000000e+00> : vector<2x384xf32>
    %108 = tpu.matmul %107, %25, %cst_24 {dimension_numbers = #tpu.dot_dimension_numbers<[1], [0], [0], [1], [0, 0, 1, 1], [], []>} : vector<2x96xbf16>, vector<96x384xbf16>, vector<2x384xf32> -> vector<2x384xf32>
    %109 = arith.addf %106, %108 : vector<2x384xf32>
    %110 = vector.extract_strided_slice %109 {offsets = [0, 0], sizes = [2, 288], strides = [1, 1]} : vector<2x384xf32> to vector<2x288xf32>
    %111 = arith.negf %110 : vector<2x288xf32>
    %112 = math.exp %111 : vector<2x288xf32>
    %cst_25 = arith.constant 1.000000e+00 : f32
    %113 = vector.broadcast %cst_25 : f32 to vector<2x288xf32>
    %114 = arith.addf %113, %112 : vector<2x288xf32>
    %115 = arith.divf %113, %114 : vector<2x288xf32>
    %116 = vector.extract_strided_slice %109 {offsets = [0, 288], sizes = [2, 96], strides = [1, 1]} : vector<2x384xf32> to vector<2x96xf32>
    %117 = math.tanh %116 : vector<2x96xf32>
    %118 = vector.extract_strided_slice %115 {offsets = [0, 96], sizes = [2, 96], strides = [1, 1]} : vector<2x288xf32> to vector<2x96xf32>
    %119 = arith.mulf %118, %100 : vector<2x96xf32>
    %120 = vector.extract_strided_slice %115 {offsets = [0, 0], sizes = [2, 96], strides = [1, 1]} : vector<2x288xf32> to vector<2x96xf32>
    %121 = arith.mulf %120, %117 : vector<2x96xf32>
    %122 = arith.addf %119, %121 : vector<2x96xf32>
    %123 = vector.extract_strided_slice %115 {offsets = [0, 192], sizes = [2, 96], strides = [1, 1]} : vector<2x288xf32> to vector<2x96xf32>
    %124 = math.tanh %122 : vector<2x96xf32>
    %125 = arith.mulf %123, %124 : vector<2x96xf32>
    %126 = vector.extract_strided_slice %125 {offsets = [0, 64], sizes = [2, 32], strides = [1, 1]} : vector<2x96xf32> to vector<2x32xf32>
    %c2_26 = arith.constant 2 : index
    %c0_27 = arith.constant 0 : index
    %127 = vector.load %arg17[%c2_26, %c0_27] : memref<16x32xf32, #tpu.memory_space<vmem>>, vector<2x32xf32>
    tpu.vector_store %arg17[%c2_26, %c0_27], %126 {strides = array<i32>} : memref<16x32xf32, #tpu.memory_space<vmem>>, vector<2x32xf32>,
    %c8 = arith.constant 8 : index
    %c0_28 = arith.constant 0 : index
    %128 = vector.load %arg16[%c8, %c0_28] : memref<16x384xf32, #tpu.memory_space<vmem>>, vector<2x384xf32>
    %129 = arith.truncf %125 : vector<2x96xf32> to vector<2x96xbf16>
    %cst_29 = arith.constant dense<0.000000e+00> : vector<2x384xf32>
    %130 = tpu.matmul %129, %25, %cst_29 {dimension_numbers = #tpu.dot_dimension_numbers<[1], [0], [0], [1], [0, 0, 1, 1], [], []>} : vector<2x96xbf16>, vector<96x384xbf16>, vector<2x384xf32> -> vector<2x384xf32>
    %131 = arith.addf %128, %130 : vector<2x384xf32>
    %132 = vector.extract_strided_slice %131 {offsets = [0, 0], sizes = [2, 288], strides = [1, 1]} : vector<2x384xf32> to vector<2x288xf32>
    %133 = arith.negf %132 : vector<2x288xf32>
    %134 = math.exp %133 : vector<2x288xf32>
    %cst_30 = arith.constant 1.000000e+00 : f32
    %135 = vector.broadcast %cst_30 : f32 to vector<2x288xf32>
    %136 = arith.addf %135, %134 : vector<2x288xf32>
    %137 = arith.divf %135, %136 : vector<2x288xf32>
    %138 = vector.extract_strided_slice %131 {offsets = [0, 288], sizes = [2, 96], strides = [1, 1]} : vector<2x384xf32> to vector<2x96xf32>
    %139 = math.tanh %138 : vector<2x96xf32>
    %140 = vector.extract_strided_slice %137 {offsets = [0, 96], sizes = [2, 96], strides = [1, 1]} : vector<2x288xf32> to vector<2x96xf32>
    %141 = arith.mulf %140, %122 : vector<2x96xf32>
    %142 = vector.extract_strided_slice %137 {offsets = [0, 0], sizes = [2, 96], strides = [1, 1]} : vector<2x288xf32> to vector<2x96xf32>
    %143 = arith.mulf %142, %139 : vector<2x96xf32>
    %144 = arith.addf %141, %143 : vector<2x96xf32>
    %145 = vector.extract_strided_slice %137 {offsets = [0, 192], sizes = [2, 96], strides = [1, 1]} : vector<2x288xf32> to vector<2x96xf32>
    %146 = math.tanh %144 : vector<2x96xf32>
    %147 = arith.mulf %145, %146 : vector<2x96xf32>
    %148 = vector.extract_strided_slice %147 {offsets = [0, 64], sizes = [2, 32], strides = [1, 1]} : vector<2x96xf32> to vector<2x32xf32>
    %c4_31 = arith.constant 4 : index
    %c0_32 = arith.constant 0 : index
    %149 = vector.load %arg17[%c4_31, %c0_32] : memref<16x32xf32, #tpu.memory_space<vmem>>, vector<2x32xf32>
    tpu.vector_store %arg17[%c4_31, %c0_32], %148 {strides = array<i32>} : memref<16x32xf32, #tpu.memory_space<vmem>>, vector<2x32xf32>,
    %c10 = arith.constant 10 : index
    %c0_33 = arith.constant 0 : index
    %150 = vector.load %arg16[%c10, %c0_33] : memref<16x384xf32, #tpu.memory_space<vmem>>, vector<2x384xf32>
    %151 = arith.truncf %147 : vector<2x96xf32> to vector<2x96xbf16>
    %cst_34 = arith.constant dense<0.000000e+00> : vector<2x384xf32>
    %152 = tpu.matmul %151, %25, %cst_34 {dimension_numbers = #tpu.dot_dimension_numbers<[1], [0], [0], [1], [0, 0, 1, 1], [], []>} : vector<2x96xbf16>, vector<96x384xbf16>, vector<2x384xf32> -> vector<2x384xf32>
    %153 = arith.addf %150, %152 : vector<2x384xf32>
    %154 = vector.extract_strided_slice %153 {offsets = [0, 0], sizes = [2, 288], strides = [1, 1]} : vector<2x384xf32> to vector<2x288xf32>
    %155 = arith.negf %154 : vector<2x288xf32>
    %156 = math.exp %155 : vector<2x288xf32>
    %cst_35 = arith.constant 1.000000e+00 : f32
    %157 = vector.broadcast %cst_35 : f32 to vector<2x288xf32>
    %158 = arith.addf %157, %156 : vector<2x288xf32>
    %159 = arith.divf %157, %158 : vector<2x288xf32>
    %160 = vector.extract_strided_slice %153 {offsets = [0, 288], sizes = [2, 96], strides = [1, 1]} : vector<2x384xf32> to vector<2x96xf32>
    %161 = math.tanh %160 : vector<2x96xf32>
    %162 = vector.extract_strided_slice %159 {offsets = [0, 96], sizes = [2, 96], strides = [1, 1]} : vector<2x288xf32> to vector<2x96xf32>
    %163 = arith.mulf %162, %144 : vector<2x96xf32>
    %164 = vector.extract_strided_slice %159 {offsets = [0, 0], sizes = [2, 96], strides = [1, 1]} : vector<2x288xf32> to vector<2x96xf32>
    %165 = arith.mulf %164, %161 : vector<2x96xf32>
    %166 = arith.addf %163, %165 : vector<2x96xf32>
    %167 = vector.extract_strided_slice %159 {offsets = [0, 192], sizes = [2, 96], strides = [1, 1]} : vector<2x288xf32> to vector<2x96xf32>
    %168 = math.tanh %166 : vector<2x96xf32>
    %169 = arith.mulf %167, %168 : vector<2x96xf32>
    %170 = vector.extract_strided_slice %169 {offsets = [0, 64], sizes = [2, 32], strides = [1, 1]} : vector<2x96xf32> to vector<2x32xf32>
    %c6_36 = arith.constant 6 : index
    %c0_37 = arith.constant 0 : index
    %171 = vector.load %arg17[%c6_36, %c0_37] : memref<16x32xf32, #tpu.memory_space<vmem>>, vector<2x32xf32>
    tpu.vector_store %arg17[%c6_36, %c0_37], %170 {strides = array<i32>} : memref<16x32xf32, #tpu.memory_space<vmem>>, vector<2x32xf32>,
    %c12 = arith.constant 12 : index
    %c0_38 = arith.constant 0 : index
    %172 = vector.load %arg16[%c12, %c0_38] : memref<16x384xf32, #tpu.memory_space<vmem>>, vector<2x384xf32>
    %173 = arith.truncf %169 : vector<2x96xf32> to vector<2x96xbf16>
    %cst_39 = arith.constant dense<0.000000e+00> : vector<2x384xf32>
    %174 = tpu.matmul %173, %25, %cst_39 {dimension_numbers = #tpu.dot_dimension_numbers<[1], [0], [0], [1], [0, 0, 1, 1], [], []>} : vector<2x96xbf16>, vector<96x384xbf16>, vector<2x384xf32> -> vector<2x384xf32>
    %175 = arith.addf %172, %174 : vector<2x384xf32>
    %176 = vector.extract_strided_slice %175 {offsets = [0, 0], sizes = [2, 288], strides = [1, 1]} : vector<2x384xf32> to vector<2x288xf32>
    %177 = arith.negf %176 : vector<2x288xf32>
    %178 = math.exp %177 : vector<2x288xf32>
    %cst_40 = arith.constant 1.000000e+00 : f32
    %179 = vector.broadcast %cst_40 : f32 to vector<2x288xf32>
    %180 = arith.addf %179, %178 : vector<2x288xf32>
    %181 = arith.divf %179, %180 : vector<2x288xf32>
    %182 = vector.extract_strided_slice %175 {offsets = [0, 288], sizes = [2, 96], strides = [1, 1]} : vector<2x384xf32> to vector<2x96xf32>
    %183 = math.tanh %182 : vector<2x96xf32>
    %184 = vector.extract_strided_slice %181 {offsets = [0, 96], sizes = [2, 96], strides = [1, 1]} : vector<2x288xf32> to vector<2x96xf32>
    %185 = arith.mulf %184, %166 : vector<2x96xf32>
    %186 = vector.extract_strided_slice %181 {offsets = [0, 0], sizes = [2, 96], strides = [1, 1]} : vector<2x288xf32> to vector<2x96xf32>
    %187 = arith.mulf %186, %183 : vector<2x96xf32>
    %188 = arith.addf %185, %187 : vector<2x96xf32>
    %189 = vector.extract_strided_slice %181 {offsets = [0, 192], sizes = [2, 96], strides = [1, 1]} : vector<2x288xf32> to vector<2x96xf32>
    %190 = math.tanh %188 : vector<2x96xf32>
    %191 = arith.mulf %189, %190 : vector<2x96xf32>
    %192 = vector.extract_strided_slice %191 {offsets = [0, 64], sizes = [2, 32], strides = [1, 1]} : vector<2x96xf32> to vector<2x32xf32>
    %c8_41 = arith.constant 8 : index
    %c0_42 = arith.constant 0 : index
    %193 = vector.load %arg17[%c8_41, %c0_42] : memref<16x32xf32, #tpu.memory_space<vmem>>, vector<2x32xf32>
    tpu.vector_store %arg17[%c8_41, %c0_42], %192 {strides = array<i32>} : memref<16x32xf32, #tpu.memory_space<vmem>>, vector<2x32xf32>,
    %c14 = arith.constant 14 : index
    %c0_43 = arith.constant 0 : index
    %194 = vector.load %arg16[%c14, %c0_43] : memref<16x384xf32, #tpu.memory_space<vmem>>, vector<2x384xf32>
    %195 = arith.truncf %191 : vector<2x96xf32> to vector<2x96xbf16>
    %cst_44 = arith.constant dense<0.000000e+00> : vector<2x384xf32>
    %196 = tpu.matmul %195, %25, %cst_44 {dimension_numbers = #tpu.dot_dimension_numbers<[1], [0], [0], [1], [0, 0, 1, 1], [], []>} : vector<2x96xbf16>, vector<96x384xbf16>, vector<2x384xf32> -> vector<2x384xf32>
    %197 = arith.addf %194, %196 : vector<2x384xf32>
    %198 = vector.extract_strided_slice %197 {offsets = [0, 0], sizes = [2, 288], strides = [1, 1]} : vector<2x384xf32> to vector<2x288xf32>
    %199 = arith.negf %198 : vector<2x288xf32>
    %200 = math.exp %199 : vector<2x288xf32>
    %cst_45 = arith.constant 1.000000e+00 : f32
    %201 = vector.broadcast %cst_45 : f32 to vector<2x288xf32>
    %202 = arith.addf %201, %200 : vector<2x288xf32>
    %203 = arith.divf %201, %202 : vector<2x288xf32>
    %204 = vector.extract_strided_slice %197 {offsets = [0, 288], sizes = [2, 96], strides = [1, 1]} : vector<2x384xf32> to vector<2x96xf32>
    %205 = math.tanh %204 : vector<2x96xf32>
    %206 = vector.extract_strided_slice %203 {offsets = [0, 96], sizes = [2, 96], strides = [1, 1]} : vector<2x288xf32> to vector<2x96xf32>
    %207 = arith.mulf %206, %188 : vector<2x96xf32>
    %208 = vector.extract_strided_slice %203 {offsets = [0, 0], sizes = [2, 96], strides = [1, 1]} : vector<2x288xf32> to vector<2x96xf32>
    %209 = arith.mulf %208, %205 : vector<2x96xf32>
    %210 = arith.addf %207, %209 : vector<2x96xf32>
    %211 = vector.extract_strided_slice %203 {offsets = [0, 192], sizes = [2, 96], strides = [1, 1]} : vector<2x288xf32> to vector<2x96xf32>
    %212 = math.tanh %210 : vector<2x96xf32>
    %213 = arith.mulf %211, %212 : vector<2x96xf32>
    %214 = vector.extract_strided_slice %213 {offsets = [0, 64], sizes = [2, 32], strides = [1, 1]} : vector<2x96xf32> to vector<2x32xf32>
    %c10_46 = arith.constant 10 : index
    %c0_47 = arith.constant 0 : index
    %215 = vector.load %arg17[%c10_46, %c0_47] : memref<16x32xf32, #tpu.memory_space<vmem>>, vector<2x32xf32>
    tpu.vector_store %arg17[%c10_46, %c0_47], %214 {strides = array<i32>} : memref<16x32xf32, #tpu.memory_space<vmem>>, vector<2x32xf32>,
    %c14_48 = arith.constant 14 : index
    %c0_49 = arith.constant 0 : index
    %216 = vector.load %arg16[%c14_48, %c0_49] : memref<16x384xf32, #tpu.memory_space<vmem>>, vector<2x384xf32>
    %217 = arith.truncf %213 : vector<2x96xf32> to vector<2x96xbf16>
    %cst_50 = arith.constant dense<0.000000e+00> : vector<2x384xf32>
    %218 = tpu.matmul %217, %25, %cst_50 {dimension_numbers = #tpu.dot_dimension_numbers<[1], [0], [0], [1], [0, 0, 1, 1], [], []>} : vector<2x96xbf16>, vector<96x384xbf16>, vector<2x384xf32> -> vector<2x384xf32>
    %219 = arith.addf %216, %218 : vector<2x384xf32>
    %220 = vector.extract_strided_slice %219 {offsets = [0, 0], sizes = [2, 288], strides = [1, 1]} : vector<2x384xf32> to vector<2x288xf32>
    %221 = arith.negf %220 : vector<2x288xf32>
    %222 = math.exp %221 : vector<2x288xf32>
    %cst_51 = arith.constant 1.000000e+00 : f32
    %223 = vector.broadcast %cst_51 : f32 to vector<2x288xf32>
    %224 = arith.addf %223, %222 : vector<2x288xf32>
    %225 = arith.divf %223, %224 : vector<2x288xf32>
    %226 = vector.extract_strided_slice %219 {offsets = [0, 288], sizes = [2, 96], strides = [1, 1]} : vector<2x384xf32> to vector<2x96xf32>
    %227 = math.tanh %226 : vector<2x96xf32>
    %228 = vector.extract_strided_slice %225 {offsets = [0, 96], sizes = [2, 96], strides = [1, 1]} : vector<2x288xf32> to vector<2x96xf32>
    %229 = arith.mulf %228, %210 : vector<2x96xf32>
    %230 = vector.extract_strided_slice %225 {offsets = [0, 0], sizes = [2, 96], strides = [1, 1]} : vector<2x288xf32> to vector<2x96xf32>
    %231 = arith.mulf %230, %227 : vector<2x96xf32>
    %232 = arith.addf %229, %231 : vector<2x96xf32>
    %233 = vector.extract_strided_slice %225 {offsets = [0, 192], sizes = [2, 96], strides = [1, 1]} : vector<2x288xf32> to vector<2x96xf32>
    %234 = math.tanh %232 : vector<2x96xf32>
    %235 = arith.mulf %233, %234 : vector<2x96xf32>
    %236 = tpu.iota {dimensions = array<i32: 1>} : vector<2x96xi32>
    %c32_i32_52 = arith.constant 32 : i32
    %237 = vector.broadcast %c32_i32_52 : i32 to vector<2x96xi32>
    %238 = arith.cmpi sge, %236, %237 : vector<2x96xi32>
    %c96_i32 = arith.constant 96 : i32
    %239 = vector.broadcast %c96_i32 : i32 to vector<2x96xi32>
    %240 = arith.cmpi slt, %236, %239 : vector<2x96xi32>
    %241 = arith.andi %238, %240 : vector<2x96xi1>
    %242 = arith.select %241, %235, %213 : vector<2x96xi1>, vector<2x96xf32>
    %243 = arith.select %241, %232, %210 : vector<2x96xi1>, vector<2x96xf32>
    %244 = vector.extract_strided_slice %235 {offsets = [0, 64], sizes = [2, 32], strides = [1, 1]} : vector<2x96xf32> to vector<2x32xf32>
    %c12_53 = arith.constant 12 : index
    %c0_54 = arith.constant 0 : index
    %245 = vector.load %arg17[%c12_53, %c0_54] : memref<16x32xf32, #tpu.memory_space<vmem>>, vector<2x32xf32>
    tpu.vector_store %arg17[%c12_53, %c0_54], %244 {strides = array<i32>} : memref<16x32xf32, #tpu.memory_space<vmem>>, vector<2x32xf32>,
    %c14_55 = arith.constant 14 : index
    %c0_56 = arith.constant 0 : index
    %246 = vector.load %arg16[%c14_55, %c0_56] : memref<16x384xf32, #tpu.memory_space<vmem>>, vector<2x384xf32>
    %247 = arith.truncf %242 : vector<2x96xf32> to vector<2x96xbf16>
    %cst_57 = arith.constant dense<0.000000e+00> : vector<2x384xf32>
    %248 = tpu.matmul %247, %25, %cst_57 {dimension_numbers = #tpu.dot_dimension_numbers<[1], [0], [0], [1], [0, 0, 1, 1], [], []>} : vector<2x96xbf16>, vector<96x384xbf16>, vector<2x384xf32> -> vector<2x384xf32>
    %249 = arith.addf %246, %248 : vector<2x384xf32>
    %250 = vector.extract_strided_slice %249 {offsets = [0, 0], sizes = [2, 288], strides = [1, 1]} : vector<2x384xf32> to vector<2x288xf32>
    %251 = arith.negf %250 : vector<2x288xf32>
    %252 = math.exp %251 : vector<2x288xf32>
    %cst_58 = arith.constant 1.000000e+00 : f32
    %253 = vector.broadcast %cst_58 : f32 to vector<2x288xf32>
    %254 = arith.addf %253, %252 : vector<2x288xf32>
    %255 = arith.divf %253, %254 : vector<2x288xf32>
    %256 = vector.extract_strided_slice %249 {offsets = [0, 288], sizes = [2, 96], strides = [1, 1]} : vector<2x384xf32> to vector<2x96xf32>
    %257 = math.tanh %256 : vector<2x96xf32>
    %258 = vector.extract_strided_slice %255 {offsets = [0, 96], sizes = [2, 96], strides = [1, 1]} : vector<2x288xf32> to vector<2x96xf32>
    %259 = arith.mulf %258, %243 : vector<2x96xf32>
    %260 = vector.extract_strided_slice %255 {offsets = [0, 0], sizes = [2, 96], strides = [1, 1]} : vector<2x288xf32> to vector<2x96xf32>
    %261 = arith.mulf %260, %257 : vector<2x96xf32>
    %262 = arith.addf %259, %261 : vector<2x96xf32>
    %263 = vector.extract_strided_slice %255 {offsets = [0, 192], sizes = [2, 96], strides = [1, 1]} : vector<2x288xf32> to vector<2x96xf32>
    %264 = math.tanh %262 : vector<2x96xf32>
    %265 = arith.mulf %263, %264 : vector<2x96xf32>
    %266 = vector.extract_strided_slice %265 {offsets = [0, 64], sizes = [2, 32], strides = [1, 1]} : vector<2x96xf32> to vector<2x32xf32>
    %c14_59 = arith.constant 14 : index
    %c0_60 = arith.constant 0 : index
    %267 = vector.load %arg17[%c14_59, %c0_60] : memref<16x32xf32, #tpu.memory_space<vmem>>, vector<2x32xf32>
    tpu.vector_store %arg17[%c14_59, %c0_60], %266 {strides = array<i32>} : memref<16x32xf32, #tpu.memory_space<vmem>>, vector<2x32xf32>,
    %c0_61 = arith.constant 0 : index
    %c0_62 = arith.constant 0 : index
    %268 = vector.load %arg17[%c0_61, %c0_62] : memref<16x32xf32, #tpu.memory_space<vmem>>, vector<16x32xf32>
    %269 = arith.truncf %268 : vector<16x32xf32> to vector<16x32xbf16>
    %c0_63 = arith.constant 0 : index
    %c0_64 = arith.constant 0 : index
    %270 = vector.load %arg5[%c0_63, %c0_64] : memref<32x16xbf16, #tpu.memory_space<vmem>>, vector<32x16xbf16>
    %cst_65 = arith.constant dense<0.000000e+00> : vector<16x16xf32>
    %271 = tpu.matmul %269, %270, %cst_65 {dimension_numbers = #tpu.dot_dimension_numbers<[1], [0], [0], [1], [0, 0, 1, 1], [], []>} : vector<16x32xbf16>, vector<32x16xbf16>, vector<16x16xf32> -> vector<16x16xf32>
    %c0_66 = arith.constant 0 : index
    %c0_67 = arith.constant 0 : index
    %272 = vector.load %arg6[%c0_66, %c0_67] : memref<1x16xf32, #tpu.memory_space<vmem>>, vector<1x16xf32>
    %273 = vector.broadcast %272 : vector<1x16xf32> to vector<16x16xf32>
    %274 = arith.addf %271, %273 : vector<16x16xf32>
    %cst_68 = arith.constant 0.000000e+00 : f32
    %275 = vector.broadcast %cst_68 : f32 to vector<16x16xf32>
    %276 = arith.cmpf ogt, %274, %275 : vector<16x16xf32>
    %cst_69 = arith.constant 0.00999999977 : f32
    %277 = vector.broadcast %cst_69 : f32 to vector<16x16xf32>
    %278 = arith.mulf %277, %274 : vector<16x16xf32>
    %279 = arith.select %276, %274, %278 : vector<16x16xi1>, vector<16x16xf32>
    %c0_70 = arith.constant 0 : index
    %c0_71 = arith.constant 0 : index
    %280 = vector.load %arg7[%c0_70, %c0_71] : memref<1x16xf32, #tpu.memory_space<vmem>>, vector<1x16xf32>
    %281 = vector.broadcast %280 : vector<1x16xf32> to vector<16x16xf32>
    %282 = arith.mulf %279, %281 : vector<16x16xf32>
    %cst_72 = arith.constant dense<0.000000e+00> : vector<16xf32>
    %283 = vector.multi_reduction <add>, %282, %cst_72 [1] : vector<16x16xf32> to vector<16xf32>
    %284 = vector.shape_cast %283 : vector<16xf32> to vector<16x1xf32>
    %c0_73 = arith.constant 0 : index
    %c0_74 = arith.constant 0 : index
    %285 = vector.load %arg8[%c0_73, %c0_74] : memref<1x1xf32, #tpu.memory_space<vmem>>, vector<1x1xf32>
    %286 = vector.broadcast %285 : vector<1x1xf32> to vector<16x1xf32>
    %287 = arith.addf %284, %286 : vector<16x1xf32>
    %c0_75 = arith.constant 0 : index
    %c0_76 = arith.constant 0 : index
    %288 = vector.load %arg9[%c0_75, %c0_76] : memref<2x16xf32, #tpu.memory_space<vmem>>, vector<2x16xf32>
    %289 = vector.extract_strided_slice %288 {offsets = [0, 0], sizes = [1, 16], strides = [1, 1]} : vector<2x16xf32> to vector<1x16xf32>
    %290 = vector.broadcast %287 : vector<16x1xf32> to vector<16x16xf32>
    %291 = vector.broadcast %289 : vector<1x16xf32> to vector<16x16xf32>
    %292 = arith.mulf %290, %291 : vector<16x16xf32>
    %c0_77 = arith.constant 0 : index
    %c0_78 = arith.constant 0 : index
    %293 = vector.load %arg1[%c0_77, %c0_78] : memref<16x1xf32, #tpu.memory_space<vmem>>, vector<16x1xf32>
    %294 = vector.extract_strided_slice %288 {offsets = [1, 0], sizes = [1, 16], strides = [1, 1]} : vector<2x16xf32> to vector<1x16xf32>
    %295 = vector.broadcast %293 : vector<16x1xf32> to vector<16x16xf32>
    %296 = vector.broadcast %294 : vector<1x16xf32> to vector<16x16xf32>
    %297 = arith.mulf %295, %296 : vector<16x16xf32>
    %298 = arith.addf %292, %297 : vector<16x16xf32>
    %c0_79 = arith.constant 0 : index
    %c0_80 = arith.constant 0 : index
    %299 = vector.load %arg10[%c0_79, %c0_80] : memref<1x16xf32, #tpu.memory_space<vmem>>, vector<1x16xf32>
    %300 = vector.broadcast %299 : vector<1x16xf32> to vector<16x16xf32>
    %301 = arith.addf %298, %300 : vector<16x16xf32>
    %cst_81 = arith.constant dense<0.000000e+00> : vector<16xf32>
    %302 = vector.multi_reduction <add>, %301, %cst_81 [1] : vector<16x16xf32> to vector<16xf32>
    %303 = vector.shape_cast %302 : vector<16xf32> to vector<16x1xf32>
    %cst_82 = arith.constant 1.600000e+01 : f32
    %304 = vector.broadcast %cst_82 : f32 to vector<16x1xf32>
    %305 = arith.divf %303, %304 : vector<16x1xf32>
    %306 = vector.broadcast %305 : vector<16x1xf32> to vector<16x16xf32>
    %307 = arith.subf %301, %306 : vector<16x16xf32>
    %308 = arith.mulf %307, %307 : vector<16x16xf32>
    %cst_83 = arith.constant dense<0.000000e+00> : vector<16xf32>
    %309 = vector.multi_reduction <add>, %308, %cst_83 [1] : vector<16x16xf32> to vector<16xf32>
    %310 = vector.shape_cast %309 : vector<16xf32> to vector<16x1xf32>
    %cst_84 = arith.constant 1.600000e+01 : f32
    %311 = vector.broadcast %cst_84 : f32 to vector<16x1xf32>
    %312 = arith.divf %310, %311 : vector<16x1xf32>
    %313 = vector.broadcast %305 : vector<16x1xf32> to vector<16x16xf32>
    %314 = arith.subf %301, %313 : vector<16x16xf32>
    %cst_85 = arith.constant 9.99999974E-6 : f32
    %315 = vector.broadcast %cst_85 : f32 to vector<16x1xf32>
    %316 = arith.addf %312, %315 : vector<16x1xf32>
    %317 = math.rsqrt %316 : vector<16x1xf32>
    %318 = vector.broadcast %317 : vector<16x1xf32> to vector<16x16xf32>
    %319 = arith.mulf %314, %318 : vector<16x16xf32>
    %c0_86 = arith.constant 0 : index
    %c0_87 = arith.constant 0 : index
    %320 = vector.load %arg11[%c0_86, %c0_87] : memref<1x16xf32, #tpu.memory_space<vmem>>, vector<1x16xf32>
    %321 = vector.broadcast %320 : vector<1x16xf32> to vector<16x16xf32>
    %322 = arith.mulf %319, %321 : vector<16x16xf32>
    %c0_88 = arith.constant 0 : index
    %c0_89 = arith.constant 0 : index
    %323 = vector.load %arg12[%c0_88, %c0_89] : memref<1x16xf32, #tpu.memory_space<vmem>>, vector<1x16xf32>
    %324 = vector.broadcast %323 : vector<1x16xf32> to vector<16x16xf32>
    %325 = arith.addf %322, %324 : vector<16x16xf32>
    %cst_90 = arith.constant 0.000000e+00 : f32
    %326 = vector.broadcast %cst_90 : f32 to vector<16x16xf32>
    %327 = arith.maximumf %325, %326 : vector<16x16xf32>
    %c0_91 = arith.constant 0 : index
    %c0_92 = arith.constant 0 : index
    %328 = vector.load %arg13[%c0_91, %c0_92] : memref<1x16xf32, #tpu.memory_space<vmem>>, vector<1x16xf32>
    %329 = vector.broadcast %328 : vector<1x16xf32> to vector<16x16xf32>
    %330 = arith.mulf %327, %329 : vector<16x16xf32>
    %cst_93 = arith.constant dense<0.000000e+00> : vector<16xf32>
    %331 = vector.multi_reduction <add>, %330, %cst_93 [1] : vector<16x16xf32> to vector<16xf32>
    %332 = vector.shape_cast %331 : vector<16xf32> to vector<16x1xf32>
    %c0_94 = arith.constant 0 : index
    %c0_95 = arith.constant 0 : index
    %333 = vector.load %arg14[%c0_94, %c0_95] : memref<1x1xf32, #tpu.memory_space<vmem>>, vector<1x1xf32>
    %334 = vector.broadcast %333 : vector<1x1xf32> to vector<16x1xf32>
    %335 = arith.addf %332, %334 : vector<16x1xf32>
    %c0_96 = arith.constant 0 : index
    %c0_97 = arith.constant 0 : index
    %336 = vector.load %arg15[%c0_96, %c0_97] : memref<16x2xf32, #tpu.memory_space<vmem>>, vector<16x1xf32>
    tpu.vector_store %arg15[%c0_96, %c0_97], %287 {strides = array<i32>} : memref<16x2xf32, #tpu.memory_space<vmem>>, vector<16x1xf32>,
    %c0_98 = arith.constant 0 : index
    %c1 = arith.constant 1 : index
    %337 = vector.load %arg15[%c0_98, %c1] : memref<16x2xf32, #tpu.memory_space<vmem>>, vector<16x1xf32>
    tpu.vector_store %arg15[%c0_98, %c1], %335 {strides = array<i32>} : memref<16x2xf32, #tpu.memory_space<vmem>>, vector<16x1xf32>,
    return
  }
}

</mosaic_0001>

<bundles_post_ra>
// kernel: tpu_custom_call.1
= control target key start
LH: loop header
LB: loop body
LE: loop exit
PB: predicated region body
PF: predicated region fallthrough
CT: control target
= control target key end

     0   :  { %s3634_s0 = inlined_call_operand.vmem [shape: f32[16,3], index: 0, kind: input, shape index: {}]   ;;  %s3635_s1 = inlined_call_operand.vmem [shape: f32[16,1], index: 1, kind: input, shape index: {}]   ;;  %s3636_s2 = inlined_call_operand.vmem [shape: f32[3,384], index: 2, kind: input, shape index: {}]   ;;  %s3637_s3 = inlined_call_operand.vmem [shape: f32[1,384], index: 3, kind: input, shape index: {}]   ;;  %s3638_s4 = inlined_call_operand.hbm [shape: bf16[96,384], index: 4, kind: input, shape index: {}]   ;;  %s3639_s5 = inlined_call_operand.vmem [shape: bf16[32,16], index: 5, kind: input, shape index: {}]   ;;  %s3640_s6 = inlined_call_operand.vmem [shape: f32[1,16], index: 6, kind: input, shape index: {}]   ;;  %s3641_s7 = inlined_call_operand.vmem [shape: f32[1,16], index: 7, kind: input, shape index: {}]   ;;  %s3642_s8 = inlined_call_operand.<no memory space> [shape: f32[1,1], index: 8, kind: input, shape index: {}]   ;;  %s3643_s9 = inlined_call_operand.vmem [shape: f32[2,16], index: 9, kind: input, shape index: {}]   ;;  %s3644_s10 = inlined_call_operand.vmem [shape: f32[1,16], index: 10, kind: input, shape index: {}]   ;;  %s3645_s11 = inlined_call_operand.vmem [shape: f32[1,16], index: 11, kind: input, shape index: {}]   ;;  %s3646_s12 = inlined_call_operand.vmem [shape: f32[1,16], index: 12, kind: input, shape index: {}]   ;;  %s3647_s13 = inlined_call_operand.vmem [shape: f32[1,16], index: 13, kind: input, shape index: {}]   ;;  %s3648_s15 = inlined_call_operand.vmem [shape: f32[16,2], index: 15, kind: output, shape index: {}]   ;;  %s3649_s14 = inlined_call_operand.<no memory space> [shape: f32[1,1], index: 14, kind: input, shape index: {}]  }
   0x1   :  { %v20_v0 = vstv %s3642_s8  ;;  %v22_v1 = vstv %s3649_s14 }
   0x2   :  { %21 = vst [vmem:[#allocation4] sm:$0x1] %v20_v0  ;;  %23 = vst [vmem:[#allocation5] sm:$0x1] %v22_v1 }
   0x3   :  { %24 = vsyncpa [#allocation7], 0  ;;  %s2841_s22 = smov [#allocation6]   ;;  %s2817_s26 = scalar_lea.hbm %s3638_s4, 2304 }
   0x4   :  { %s38_s23 = sshll.u32 %s2841_s22, 4  ;;  %p2818_p0 = scmp.ne.s32.totalorder %s3638_s4, %s2817_s26  ;;  %s39_s23 = int_to_ptr.vmem [resolvable:$true] %s38_s23 }
   0x5   :  { %p2821_p1 = scmp.lt.u32.totalorder %s2817_s26, %s3638_s4 }
   0x7   :  { %p2823_p2 = pnand %p2821_p1, %p2818_p0 }
   0x9   :  { %2826 = shalt.err (!%p2823_p2)
}
   0xa   :  { %s2827_s14 = scalar_lea.vmem %s39_s23, 2304  ;;  %p2832_p4 = scmp.lt.s32.totalorder %s39_s23, %s39_s23 }
   0xb   :  { %p2828_p3 = scmp.ne.s32.totalorder %s39_s23, %s2827_s14  ;;  %p2833_p5 = scmp.lt.s32.totalorder %s2827_s14, %s2827_s14 }
   0xd   :  { %p2834_p6 = por %p2833_p5, %p2832_p4 }
   0xf   :  { %p2835_p7 = pnand %p2834_p6, %p2828_p3 }
  0x11   :  { %2838 = shalt.err (!%p2835_p7)
}
  0x12   :  { %s2842_s30 = smov 192   ;;  %s2843_s16 = smov 12  }
  0x13   :  { %44 = dma.hbm_to_vmem [thread:$0]  %s3638_s4, 2304, %s39_s23, [#allocation7], %s2842_s30, %s2842_s30, %s2843_s16  }
  0x14   :  { %2839 = dma.done.wait [#allocation7], 2304  }
  0x15   :  { %2840 = vsyncadd [#allocation7], 4294964992  ;;  %v2844_v2 = vmov 0.0   ;;  %vm2845_vm0 = vmmov 0   ;;  %v2846_v3 = vmov 0   ;;  %v2847_v4 = vmov 2  }
  0x16   :  { %2384 = vmatprep.subr.bf16.mxu1 %v2844_v2  ;;  %2396 = vmatprep.mubr.msk.bf16.mxu1 %vm2845_vm0, %v2844_v2  ;;  %v2957_v5 = vld [vmem:[#allocation6 + $0x4] ss:$12 sps:$4 sm:$0xff]   ;;  %v2959_v6 = vld [vmem:[#allocation6 + $0x8] ss:$12 sps:$4 sm:$0xff]   ;;  %v2962_v7 = vld [vmem:[#allocation6] ss:$12 sps:$4 sm:$0xff]   ;;  %v89_v28 = vlaneseq }
  0x17   :  { %403 = vmatprep.mubr.bf16.mxu0 %v2846_v3  ;;  %2564 = vset.pattern.permute.xlu0 %v2846_v3  ;;  %v2965_v8 = vld [vmem:[#allocation6 + $0x1c] ss:$12 sps:$4 sm:$0xff]   ;;  %v2969_v9 = vld [vmem:[#allocation6 + $0x20] ss:$12 sps:$4 sm:$0xff]   ;;  %v2971_v10 = vld [vmem:[#allocation6 + $0x18] ss:$12 sps:$4 sm:$0xff]  }
  0x18   :  { %2566 = vset.pattern.permute.xlu1 %v2847_v4  ;;  %371 = vmatprep.subr.bf16.mxu0 %v2957_v5  ;;  %v2974_v11 = vld [vmem:[#allocation6 + $0x34] ss:$12 sps:$4 sm:$0xff]   ;;  %v2977_v12 = vld [vmem:[#allocation6 + $0x38] ss:$12 sps:$4 sm:$0xff]   ;;  %v2981_v13 = vld [vmem:[#allocation6 + $0x30] ss:$12 sps:$4 sm:$0xff]  }
  0x19   :  { %2385 = vmatpush3.bf16.msra.mxu1 %v2959_v6  ;;  %372 = vmatpush1.bf16.msra.mxu0 %v2962_v7  ;;  %v2984_v14 = vld [vmem:[#allocation6 + $0x4c] ss:$12 sps:$4 sm:$0xff]   ;;  %v2987_v15 = vld [vmem:[#allocation6 + $0x50] ss:$12 sps:$4 sm:$0xff]   ;;  %v2991_v16 = vld [vmem:[#allocation6 + $0x48] ss:$12 sps:$4 sm:$0xff]  }
  0x1a   :  { %2386 = vmatprep.subr.bf16.mxu1 %v2844_v2  ;;  %373 = vmatprep.subr.bf16.mxu0 %v2965_v8  ;;  %v2994_v17 = vld [vmem:[#allocation6 + $0x64] ss:$12 sps:$4 sm:$0xff]   ;;  %v3003_v20 = vld [vmem:[#allocation6 + $0x68] ss:$12 sps:$4 sm:$0xff]   ;;  %v3005_v21 = vld [vmem:[#allocation6 + $0x60] ss:$12 sps:$4 sm:$0xff]  }
  0x1b   :  { %v69_v18 = vld [vmem:[%s3634_s0] sm:$0xff]  ;;  %v70_v19 = vld [vmem:[%s3634_s0 + $0x8] sm:$0xff]  ;;  %v2848_v27 = vmov 1   ;;  %v90_v29 = vshrl.u32 %v89_v28, 7  ;;  %vm367_vm1 = vcmask 785408   ;;  %s2851_s27 = smov 64  }
  0x1c   :  { %v3007_v22 = vpack.c.bf16 %v70_v19, %v69_v18  ;;  %v3012_v23 = vld [vmem:[#allocation6 + $0x7c] ss:$12 sps:$4 sm:$0xff]   ;;  %v3016_v25 = vld [vmem:[#allocation6 + $0x80] ss:$12 sps:$4 sm:$0xff]   ;;  %v3020_v26 = vld [vmem:[#allocation6 + $0x78] ss:$12 sps:$4 sm:$0xff]  }
  0x1d   :  { %2387 = vmatpush3.bf16.msra.mxu1 %v2969_v9  ;;  %374 = vmatpush1.bf16.msra.mxu0 %v2971_v10  ;;  %v3058_v30 = vsub.s32 0, %v90_v29  ;;  %v95_v31 = vsub.s32 4, %v90_v29  ;;  %v74_v32 = vld [vmem:[%s3636_s2] sm:$0x77]  ;;  %v75_v33 = vld [vmem:[%s3636_s2 + $0x8] sm:$0x7] }
  0x1e   :  { %2388 = vmatprep.subr.bf16.mxu1 %v2844_v2  ;;  %375 = vmatprep.subr.bf16.mxu0 %v2974_v11  ;;  %v72_v24 = vunpack.c.l.bf16 %v3007_v22  ;;  %v133_v34 = vsub.s32 2, %v90_v29  ;;  %v205_v38 = vsub.s32 6, %v90_v29  ;;  %v3068_v39 = vsub.s32 1, %v90_v29  ;;  %v76_v42 = vld [vmem:[%s3637_s3] sm:$0x7]  ;;  %s2849_s2 = smov 96  }
  0x1f   :  { %v92_v35 = vrot.slane %v74_v32, %v3058_v30  ;;  %v96_v36 = vrot.slane %v74_v32, %v95_v31  ;;  %v100_v37 = vrot.slane %v75_v33, %v3058_v30  ;;  %v158_v40 = vsub.s32 5, %v90_v29  ;;  %s2850_s3 = smov 32  }
  0x20   :  { %79 = vperm.xlu0 %2564, %v72_v24   ;;  %192 = vperm.xlu1 %2566, %v72_v24   ;;  %v202_v41 = vrot.slane %v74_v32, %v133_v34  ;;  %v206_v46 = vrot.slane %v74_v32, %v205_v38  ;;  %v155_v47 = vrot.slane %v74_v32, %v3068_v39  ;;  %vm511_vm2 = vcmask 523264  }
  0x21   :  { %2389 = vmatpush3.bf16.msra.mxu1 %v2977_v12  ;;  %376 = vmatpush1.bf16.msra.mxu0 %v2981_v13  ;;  %v3074_v43 = vrot.slane %v92_v35, %v3058_v30  ;;  %v3077_v44 = vrot.slane %v96_v36, %v3058_v30  ;;  %v3080_v45 = vrot.slane %v100_v37, %v3058_v30  ;;  %vm521_vm4 = vcmask 261120  }
  0x22   :  { %2390 = vmatprep.subr.bf16.mxu1 %v2844_v2  ;;  %377 = vmatprep.subr.bf16.mxu0 %v2984_v14  ;;  %v159_v48 = vrot.slane %v74_v32, %v158_v40  ;;  %v163_v49 = vrot.slane %v75_v33, %v3068_v39  ;;  %v210_v50 = vrot.slane %v75_v33, %v133_v34  ;;  %vm849_vm6 = vcmask 259076  }
  0x23   :  { %v3085_v51 = vrot.slane %v76_v42, %v3058_v30  ;;  %v3088_v52 = vrot.slane %v76_v42, %v3068_v39  ;;  %v3090_v53 = vrot.slane %v76_v42, %v133_v34  ;;  %v3092_v55 = vrot.slane %v202_v41, %v133_v34 }
  0x24   :  { %2565 = vset.pattern.permute.xlu0 %v2848_v27  ;;  %2578 = vset.pattern.permute.xlu1 %v2848_v27  ;;  %v3097_v59 = vrot.slane %v206_v46, %v133_v34  ;;  %v3100_v60 = vrot.slane %v155_v47, %v3068_v39  ;;  %v3103_v61 = vrot.slane %v159_v48, %v3068_v39  ;;  %vm1013_vm7 = vcmask 261126  }
  0x25   :  { %2391 = vmatpush3.bf16.msra.mxu1 %v2987_v15  ;;  %378 = vmatpush1.bf16.msra.mxu0 %v2991_v16  ;;  %v3106_v62 = vrot.slane %v163_v49, %v3068_v39  ;;  %v3108_v63 = vrot.slane %v210_v50, %v133_v34  ;;  %vm1167_vm8 = vcmask 254976   ;;  %vm1328_vm9 = vcmask 257026  }
  0x26   :  { %2392 = vmatprep.subr.bf16.mxu1 %v2844_v2  ;;  %379 = vmatprep.subr.bf16.mxu0 %v2994_v17  ;;  %vm2082_vm15 = vcmask 130048  }
  0x27   :  { %145 = vperm.xlu0 %2565, %v72_v24  }
  0x29   :  { %2393 = vmatpush3.bf16.msra.mxu1 %v3003_v20  ;;  %380 = vmatpush1.bf16.msra.mxu0 %v3005_v21 }
  0x2a   :  { %2394 = vmatprep.subr.bf16.mxu1 %v2844_v2  ;;  %381 = vmatprep.subr.bf16.mxu0 %v3012_v23 }
  0x2b   :  { %2577 = vset.pattern.permute.xlu0 %v2846_v3 }
  0x2d   :  { %2395 = vmatpush3.bf16.msra.mxu1 %v3016_v25  ;;  %382 = vmatpush1.bf16.msra.mxu0 %v3020_v26 }
  0x2e   :  { %532 = vmatprep.subr.bf16.mxu0 %v2957_v5  ;;  %2400 = vmatprep.subr.bf16.mxu1 %v2844_v2 }
  0x30   :  { %2397 = vmatmul.mubr.bf16.vlgmr.msra.gmra.mrb[0].mxu1 %v2846_v3  ;;  %404 = vmatmul.mubr.bf16.vlgmr.msra.gmra.mrb[0].mxu0 %v2846_v3 }
  0x31   :  { %2401 = vmatpush3.bf16.msra.mxu1 %v2959_v6  ;;  %533 = vmatpush1.bf16.msra.mxu0 %v2962_v7 }
  0x32   :  { %2402 = vmatprep.subr.bf16.mxu1 %v2844_v2  ;;  %534 = vmatprep.subr.bf16.mxu0 %v2965_v8 }
  0x33   :  { %564 = vmatprep.mubr.bf16.mxu0 %v2846_v3  ;;  %2412 = vmatprep.mubr.msk.bf16.mxu1 %vm2845_vm0, %v2844_v2 }
  0x35   :  { %2403 = vmatpush3.bf16.msra.mxu1 %v2969_v9  ;;  %535 = vmatpush1.bf16.msra.mxu0 %v2971_v10 }
  0x36   :  { %2404 = vmatprep.subr.bf16.mxu1 %v2844_v2  ;;  %536 = vmatprep.subr.bf16.mxu0 %v2974_v11 }
  0x39   :  { %2405 = vmatpush3.bf16.msra.mxu1 %v2977_v12  ;;  %537 = vmatpush1.bf16.msra.mxu0 %v2981_v13 }
  0x3a   :  { %2406 = vmatprep.subr.bf16.mxu1 %v2844_v2  ;;  %538 = vmatprep.subr.bf16.mxu0 %v2984_v14 }
  0x3d   :  { %2407 = vmatpush3.bf16.msra.mxu1 %v2987_v15  ;;  %539 = vmatpush1.bf16.msra.mxu0 %v2991_v16 }
  0x3e   :  { %2408 = vmatprep.subr.bf16.mxu1 %v2844_v2  ;;  %540 = vmatprep.subr.bf16.mxu0 %v2994_v17 }
  0x41   :  { %2409 = vmatpush3.bf16.msra.mxu1 %v3003_v20  ;;  %541 = vmatpush1.bf16.msra.mxu0 %v3005_v21 }
  0x42   :  { %2410 = vmatprep.subr.bf16.mxu1 %v2844_v2  ;;  %542 = vmatprep.subr.bf16.mxu0 %v3012_v23 }
  0x45   :  { %2411 = vmatpush3.bf16.msra.mxu1 %v3016_v25  ;;  %543 = vmatpush1.bf16.msra.mxu0 %v3020_v26 }
  0x46   :  { %2416 = vmatprep.subr.bf16.mxu1 %v2844_v2  ;;  %706 = vmatprep.subr.bf16.mxu0 %v2957_v5 }
  0x9f   :  { %v80_v54 = vpop.permute.xlu0 %79  ;;  %v193_v0 = vpop.permute.xlu1 %192 }
  0xa0   :  { %v116_v56 = vmul.f32 %v3074_v43, %v80_v54  ;;  %v117_v57 = vmul.f32 %v3077_v44, %v80_v54  ;;  %v118_v58 = vmul.f32 %v3080_v45, %v80_v54  ;;  %v226_v27 = vmul.f32 %v3092_v55, %v193_v0 }
  0xa1   :  { %v227_v29 = vmul.f32 %v3097_v59, %v193_v0  ;;  %v228_v34 = vmul.f32 %v3108_v63, %v193_v0 }
  0xa2   :  { %v138_v1 = vadd.f32 %v3085_v51, %v116_v56  ;;  %v139_v18 = vadd.f32 %v3088_v52, %v117_v57  ;;  %v140_v19 = vadd.f32 %v3090_v53, %v118_v58 }
  0xa6   :  { %v146_v24 = vpop.permute.xlu0 %145 }
  0xa7   :  { %v179_v31 = vmul.f32 %v3100_v60, %v146_v24  ;;  %v180_v32 = vmul.f32 %v3103_v61, %v146_v24  ;;  %v181_v33 = vmul.f32 %v3106_v62, %v146_v24 }
  0xa9   :  { %v185_v35 = vadd.f32 %v179_v31, %v138_v1  ;;  %v186_v36 = vadd.f32 %v180_v32, %v139_v18  ;;  %v187_v37 = vadd.f32 %v181_v33, %v140_v19 }
  0xab   :  { %v232_v38 = vadd.f32 %v226_v27, %v185_v35  ;;  %v233_v40 = vadd.f32 %v227_v29, %v186_v36  ;;  %v234_v41 = vadd.f32 %v228_v34, %v187_v37 }
  0xad   :  { %238 = vst [vmem:[#allocation2] sm:$0xff] %v232_v38  ;;  %239 = vst [vmem:[#allocation2 + $0x8] sm:$0xff] %v233_v40 }
  0xae   :  { %240 = vst [vmem:[#allocation2 + $0x10] sm:$0xff] %v234_v41 }
  0xb4   :  { %v268_v1 = vld [vmem:[#allocation2] sm:$0x3]  ;;  %v269_v33 = vld [vmem:[#allocation2 + $0x8] sm:$0x3] }
  0xb5   :  { %v270_v42 = vld [vmem:[#allocation2 + $0x10] sm:$0x3] }
 0x103   :  { %v446_v46 = vpop.f32.mrb[0].mxu1  ;;  %v405_v48 = vpop.f32.mrb[0].mxu0 }
 0x104   :  { %v454_v47 = vadd.f32 %v446_v46, %v270_v42  ;;  %v2398_v49 = vpop.f32.mrb[1].mxu1  ;;  %v407_v50 = vpop.f32.mrb[1].mxu0  ;;  %v452_v18 = vadd.f32 %v405_v48, %v268_v1 }
 0x105   :  { %v449_v54 = vpop.f32.mrb[2].mxu1  ;;  %v409_v57 = vpop.f32.mrb[2].mxu0  ;;  %v453_v34 = vadd.f32 %v407_v50, %v269_v33 }
 0x106   :  { %2617 = vtanh.f32 %v454_v47  ;;  %v2399_v56 = vpop.f32.mrb[3].mxu1  ;;  %v410_v58 = vpop.f32.mrb[3].mxu0  ;;  %v2252_v19 = vmul.f32 -1.442695, %v452_v18  ;;  %v2254_v50 = vmul.f32 -1.442695, %v454_v47 }
 0x107   :  { %v2253_v35 = vmul.f32 -1.442695, %v453_v34  ;;  %v3128_v47 = vand.u32 127, %v89_v28 }
 0x108   :  { %2619 = vpow2.f32 %v2252_v19 }
 0x109   :  { %vm503_vm3 = vcmp.lt.s32.totalorder %v3128_v47, 32  ;;  %vm675_vm5 = vcmp.lt.s32.totalorder %v3128_v47, 64  ;;  %vm1809_vm10 = vcmp.ge.s32.totalorder %v3128_v47, 32  ;;  %vm1810_vm11 = vcmp.lt.s32.totalorder %v3128_v47, 96 }
 0x10a   :  { %vm3556_vm12 = vmand %vm1809_vm10, %vm1810_vm11 }
 0x110   :  { %v2618_v0 = vpop.eup %2617 }
 0x111   :  { %477 = vrot.lane.b32.xlu1 %v2618_v0, %s2849_s2 }
 0x112   :  { %v2620_v24 = vpop.eup %2619 }
 0x113   :  { %v464_v27 = vadd.f32 1.0, %v2620_v24 }
 0x115   :  { %2621 = vrcp.f32 %v464_v27 }
 0x116   :  { %2623 = vpow2.f32 %v2253_v35 }
 0x11f   :  { %v2622_v29 = vpop.eup %2621 }
 0x120   :  { %v2624_v36 = vpop.eup %2623  ;;  %v474_v41 = vmul.f32 0.0, %v2622_v29 }
 0x121   :  { %v465_v37 = vadd.f32 1.0, %v2624_v36 }
 0x123   :  { %2625 = vrcp.f32 %v465_v37 }
 0x12d   :  { %v2626_v38 = vpop.eup %2625 }
 0x12e   :  { %v475_v40 = vmul.f32 0.0, %v2626_v38 }
 0x183   :  { %v478_v31 = vpop.permute.xlu1 %477 }
 0x184   :  { %v480_v32 = vmul.f32 %v2622_v29, %v478_v31 }
 0x186   :  { %482 = vrot.lane.b32.xlu1 %v480_v32, %s2849_s2 }
 0x1f8   :  { %v483_v42 = vpop.permute.xlu1 %482 }
 0x1f9   :  { %v485_v46 = vadd.f32 %v483_v42, %v474_v41  ;;  %v486_v48 = vadd.f32 %v483_v42, %v475_v40 }
 0x1fb   :  { %2627 = vtanh.f32 %v485_v46 }
 0x1fc   :  { %2629 = vtanh.f32 %v486_v48 }
 0x1fd   :  { %2631 = vpow2.f32 %v2254_v50 }
 0x205   :  { %v2628_v49 = vpop.eup %2627 }
 0x206   :  { %v2630_v54 = vpop.eup %2629  ;;  %491 = vrot.lane.b32.xlu0 %v2628_v49, %s2849_s2 }
 0x207   :  { %493 = vrot.lane.b32.xlu1 %v2630_v54, %s2849_s2  ;;  %v2632_v56 = vpop.eup %2631  ;;  %v527_v54 = vld [vmem:[#allocation2 + $0x10] sm:$0xc] }
 0x208   :  { %v466_v57 = vadd.f32 1.0, %v2632_v56 }
 0x20a   :  { %2633 = vrcp.f32 %v466_v57 }
 0x20b   :  { %517 = vrot.lane.b32.xlu1 %v485_v46, %s2850_s3 }
 0x214   :  { %v2634_v0 = vpop.eup %2633 }
 0x278   :  { %v492_v58 = vpop.permute.xlu0 %491 }
 0x279   :  { %v494_v1 = vpop.permute.xlu1 %493 }
 0x27a   :  { %v499_v18 = vmul.f32 %v2634_v0, %v494_v1  ;;  %v495_v19 = vsel %vm367_vm1, %v492_v58, %v494_v1 }
 0x27b   :  { %v498_v24 = vmul.f32 %v2626_v38, %v495_v19  ;;  %v525_v19 = vld [vmem:[#allocation2] sm:$0xc] }
 0x27d   :  { %v2567_v27 = vpack.i.bf16 %v499_v18, %v498_v24  ;;  %v518_v34 = vpop.permute.xlu1 %517 }
 0x27f   :  { %2568 = vrot.lane.b32.xlu0 %v2567_v27, %s2851_s27 }
 0x283   :  { %519 = vrot.lane.b32.xlu0 %v486_v48, %s2850_s3 }
 0x2f1   :  { %v2569_v29 = vpop.permute.xlu0 %2568 }
 0x2f2   :  { %v2571_v31 = vunpack.i.h.bf16 %v2569_v29  ;;  %v2570_v32 = vunpack.i.l.bf16 %v2569_v29 }
 0x2f4   :  { %v512_v33 = vsel %vm511_vm2, %v2570_v32, %v2571_v31 }
 0x2f5   :  { %v520_v35 = vpop.permute.xlu0 %519  ;;  %v3132_v36 = vsel %vm503_vm3, %v512_v33, 0.0 }
 0x2f6   :  { %v522_v37 = vsel %vm521_vm4, %v518_v34, %v520_v35  ;;  %v528_v38 = vpack.c.bf16 %v3132_v36, %v3132_v36 }
 0x2f7   :  { %v3137_v28 = vsel %vm503_vm3, %v522_v37, 0.0  ;;  %v526_v37 = vld [vmem:[#allocation2 + $0x8] sm:$0xc] }
 0x2f8   :  { %v645_v40 = vrot.slane %v3137_v28, 6  ;;  %2255 = vmatmul.mubr.msk.bf16.vlgmr.msra.gmra.mrb[4].mxu0 %vm367_vm1, %v528_v38  ;;  %2413 = vmatmul.mubr.msk.bf16.vlgmr.msra.gmra.mrb[4].mxu1 %vm367_vm1, %v528_v38 }
 0x2f9   :  { %707 = vmatpush1.bf16.msra.mxu0 %v2962_v7  ;;  %2417 = vmatpush3.bf16.msra.mxu1 %v2959_v6 }
 0x2fa   :  { %646 = vrot.lane.b32.xlu0 %v645_v40, %s2849_s2  ;;  %708 = vmatprep.subr.bf16.mxu0 %v2965_v8 }
 0x2fb   :  { %2418 = vmatprep.subr.bf16.mxu1 %v2844_v2  ;;  %738 = vmatprep.mubr.bf16.mxu0 %v2846_v3 }
 0x2fc   :  { %2428 = vmatprep.mubr.msk.bf16.mxu1 %vm2845_vm0, %v2844_v2 }
 0x2fd   :  { %709 = vmatpush1.bf16.msra.mxu0 %v2971_v10  ;;  %2419 = vmatpush3.bf16.msra.mxu1 %v2969_v9 }
 0x2fe   :  { %710 = vmatprep.subr.bf16.mxu0 %v2974_v11  ;;  %2420 = vmatprep.subr.bf16.mxu1 %v2844_v2 }
 0x301   :  { %711 = vmatpush1.bf16.msra.mxu0 %v2981_v13  ;;  %2421 = vmatpush3.bf16.msra.mxu1 %v2977_v12 }
 0x302   :  { %712 = vmatprep.subr.bf16.mxu0 %v2984_v14  ;;  %2422 = vmatprep.subr.bf16.mxu1 %v2844_v2 }
 0x305   :  { %713 = vmatpush1.bf16.msra.mxu0 %v2991_v16  ;;  %2423 = vmatpush3.bf16.msra.mxu1 %v2987_v15 }
 0x306   :  { %714 = vmatprep.subr.bf16.mxu0 %v2994_v17  ;;  %2424 = vmatprep.subr.bf16.mxu1 %v2844_v2 }
 0x309   :  { %715 = vmatpush1.bf16.msra.mxu0 %v3005_v21  ;;  %2425 = vmatpush3.bf16.msra.mxu1 %v3003_v20 }
 0x30a   :  { %716 = vmatprep.subr.bf16.mxu0 %v3012_v23  ;;  %2426 = vmatprep.subr.bf16.mxu1 %v2844_v2 }
 0x30d   :  { %717 = vmatpush1.bf16.msra.mxu0 %v3020_v26  ;;  %2427 = vmatpush3.bf16.msra.mxu1 %v3016_v25 }
 0x30e   :  { %869 = vmatprep.subr.bf16.mxu0 %v2957_v5  ;;  %2432 = vmatprep.subr.bf16.mxu1 %v2844_v2 }
 0x3cb   :  { %v566_v41 = vpop.f32.mrb[4].mxu0  ;;  %v607_v42 = vpop.f32.mrb[4].mxu1 }
 0x3cc   :  { %v618_v46 = vrot.slane %v607_v42, 6  ;;  %v568_v48 = vpop.f32.mrb[5].mxu0  ;;  %v2414_v49 = vpop.f32.mrb[5].mxu1  ;;  %v616_v18 = vrot.slane %v566_v41, 6 }
 0x3cd   :  { %v570_v50 = vpop.f32.mrb[6].mxu0  ;;  %v610_v56 = vpop.f32.mrb[6].mxu1  ;;  %v617_v35 = vrot.slane %v568_v48, 6 }
 0x3ce   :  { %v624_v57 = vadd.f32 %v618_v46, %v527_v54  ;;  %v571_v58 = vpop.f32.mrb[7].mxu0  ;;  %v2415_v0 = vpop.f32.mrb[7].mxu1  ;;  %v622_v24 = vadd.f32 %v616_v18, %v525_v19 }
 0x3cf   :  { %v623_v38 = vadd.f32 %v617_v35, %v526_v37  ;;  %v647_v49 = vpop.permute.xlu0 %646 }
 0x3d0   :  { %2635 = vtanh.f32 %v624_v57  ;;  %v2257_v27 = vmul.f32 -1.442695, %v622_v24  ;;  %v2259_v19 = vmul.f32 -1.442695, %v624_v57 }
 0x3d1   :  { %v2258_v40 = vmul.f32 -1.442695, %v623_v38 }
 0x3d2   :  { %2637 = vpow2.f32 %v2257_v27 }
 0x3da   :  { %v2636_v1 = vpop.eup %2635 }
 0x3db   :  { %652 = vrot.lane.b32.xlu1 %v2636_v1, %s2849_s2 }
 0x3dc   :  { %v2638_v29 = vpop.eup %2637 }
 0x3dd   :  { %v634_v31 = vadd.f32 1.0, %v2638_v29 }
 0x3df   :  { %2639 = vrcp.f32 %v634_v31 }
 0x3e0   :  { %2641 = vpow2.f32 %v2258_v40 }
 0x3e9   :  { %v2640_v32 = vpop.eup %2639 }
 0x3ea   :  { %v2642_v42 = vpop.eup %2641  ;;  %v649_v54 = vmul.f32 %v2640_v32, %v647_v49 }
 0x3eb   :  { %v635_v46 = vadd.f32 1.0, %v2642_v42 }
 0x3ed   :  { %2643 = vrcp.f32 %v635_v46 }
 0x3f7   :  { %v2644_v41 = vpop.eup %2643 }
 0x3f8   :  { %v650_v50 = vmul.f32 %v2644_v41, %v647_v49 }
 0x44d   :  { %v653_v33 = vpop.permute.xlu1 %652 }
 0x44e   :  { %v655_v34 = vmul.f32 %v2640_v32, %v653_v33 }
 0x450   :  { %657 = vrot.lane.b32.xlu1 %v655_v34, %s2849_s2 }
 0x4c2   :  { %v658_v56 = vpop.permute.xlu1 %657 }
 0x4c3   :  { %v660_v58 = vadd.f32 %v658_v56, %v649_v54  ;;  %v661_v0 = vadd.f32 %v658_v56, %v650_v50 }
 0x4c5   :  { %2645 = vtanh.f32 %v660_v58  ;;  %v690_v48 = vrot.slane %v660_v58, 2  ;;  %v691_v42 = vrot.slane %v661_v0, 2 }
 0x4c6   :  { %2647 = vtanh.f32 %v661_v0 }
 0x4c7   :  { %2649 = vpow2.f32 %v2259_v19 }
 0x4cf   :  { %v2646_v1 = vpop.eup %2645 }
 0x4d0   :  { %v2648_v18 = vpop.eup %2647  ;;  %666 = vrot.lane.b32.xlu0 %v2646_v1, %s2849_s2 }
 0x4d1   :  { %668 = vrot.lane.b32.xlu1 %v2648_v18, %s2849_s2  ;;  %v2650_v24 = vpop.eup %2649 }
 0x4d2   :  { %v636_v27 = vadd.f32 1.0, %v2650_v24 }
 0x4d4   :  { %2651 = vrcp.f32 %v636_v27  ;;  %v701_v27 = vld [vmem:[#allocation2 + $0x10] sm:$0x30] }
 0x4d5   :  { %692 = vrot.lane.b32.xlu1 %v690_v48, %s2850_s3 }
 0x4de   :  { %v2652_v31 = vpop.eup %2651 }
 0x542   :  { %v667_v29 = vpop.permute.xlu0 %666 }
 0x543   :  { %v669_v32 = vpop.permute.xlu1 %668 }
 0x544   :  { %v670_v33 = vsel %vm367_vm1, %v667_v29, %v669_v32  ;;  %v674_v34 = vmul.f32 %v2652_v31, %v669_v32 }
 0x545   :  { %v673_v35 = vmul.f32 %v2644_v41, %v670_v33 }
 0x546   :  { %v680_v37 = vrot.slane %v674_v34, 2 }
 0x547   :  { %v679_v38 = vrot.slane %v673_v35, 2  ;;  %v693_v50 = vpop.permute.xlu1 %692 }
 0x549   :  { %v2572_v40 = vpack.i.bf16 %v680_v37, %v679_v38  ;;  %v699_v38 = vld [vmem:[#allocation2] sm:$0x30] }
 0x54b   :  { %2573 = vrot.lane.b32.xlu0 %v2572_v40, %s2851_s27 }
 0x54f   :  { %694 = vrot.lane.b32.xlu0 %v691_v42, %s2850_s3 }
 0x5bd   :  { %v2574_v57 = vpop.permute.xlu0 %2573 }
 0x5be   :  { %v2576_v46 = vunpack.i.h.bf16 %v2574_v57  ;;  %v2575_v49 = vunpack.i.l.bf16 %v2574_v57 }
 0x5c0   :  { %v685_v54 = vsel %vm511_vm2, %v2575_v49, %v2576_v46 }
 0x5c1   :  { %v695_v56 = vpop.permute.xlu0 %694  ;;  %v687_v58 = vsel %vm675_vm5, %v685_v54, %v3132_v36 }
 0x5c2   :  { %v696_v41 = vsel %vm521_vm4, %v693_v50, %v695_v56  ;;  %v702_v1 = vpack.c.bf16 %v687_v58, %v687_v58  ;;  %v700_v58 = vld [vmem:[#allocation2 + $0x8] sm:$0x30] }
 0x5c3   :  { %v698_v18 = vsel %vm675_vm5, %v696_v41, %v3137_v28 }
 0x5c4   :  { %2260 = vmatmul.mubr.msk.bf16.vlgmr.msra.gmra.mrb[8].mxu0 %vm367_vm1, %v702_v1  ;;  %2429 = vmatmul.mubr.msk.bf16.vlgmr.msra.gmra.mrb[8].mxu1 %vm367_vm1, %v702_v1  ;;  %v819_v0 = vrot.slane %v698_v18, 4 }
 0x5c5   :  { %870 = vmatpush1.bf16.msra.mxu0 %v2962_v7  ;;  %2433 = vmatpush3.bf16.msra.mxu1 %v2959_v6 }
 0x5c6   :  { %820 = vrot.lane.b32.xlu0 %v819_v0, %s2849_s2  ;;  %871 = vmatprep.subr.bf16.mxu0 %v2965_v8 }
 0x5c7   :  { %2434 = vmatprep.subr.bf16.mxu1 %v2844_v2  ;;  %901 = vmatprep.mubr.bf16.mxu0 %v2846_v3 }
 0x5c8   :  { %2444 = vmatprep.mubr.msk.bf16.mxu1 %vm2845_vm0, %v2844_v2 }
 0x5c9   :  { %872 = vmatpush1.bf16.msra.mxu0 %v2971_v10  ;;  %2435 = vmatpush3.bf16.msra.mxu1 %v2969_v9 }
 0x5ca   :  { %873 = vmatprep.subr.bf16.mxu0 %v2974_v11  ;;  %2436 = vmatprep.subr.bf16.mxu1 %v2844_v2 }
 0x5cd   :  { %874 = vmatpush1.bf16.msra.mxu0 %v2981_v13  ;;  %2437 = vmatpush3.bf16.msra.mxu1 %v2977_v12 }
 0x5ce   :  { %875 = vmatprep.subr.bf16.mxu0 %v2984_v14  ;;  %2438 = vmatprep.subr.bf16.mxu1 %v2844_v2 }
 0x5d1   :  { %876 = vmatpush1.bf16.msra.mxu0 %v2991_v16  ;;  %2439 = vmatpush3.bf16.msra.mxu1 %v2987_v15 }
 0x5d2   :  { %877 = vmatprep.subr.bf16.mxu0 %v2994_v17  ;;  %2440 = vmatprep.subr.bf16.mxu1 %v2844_v2 }
 0x5d5   :  { %878 = vmatpush1.bf16.msra.mxu0 %v3005_v21  ;;  %2441 = vmatpush3.bf16.msra.mxu1 %v3003_v20 }
 0x5d6   :  { %879 = vmatprep.subr.bf16.mxu0 %v3012_v23  ;;  %2442 = vmatprep.subr.bf16.mxu1 %v2844_v2 }
 0x5d9   :  { %880 = vmatpush1.bf16.msra.mxu0 %v3020_v26  ;;  %2443 = vmatpush3.bf16.msra.mxu1 %v3016_v25 }
 0x5da   :  { %1032 = vmatprep.subr.bf16.mxu0 %v2957_v5  ;;  %2448 = vmatprep.subr.bf16.mxu1 %v2844_v2 }
 0x697   :  { %v740_v36 = vpop.f32.mrb[8].mxu0  ;;  %v781_v28 = vpop.f32.mrb[8].mxu1 }
 0x698   :  { %v792_v48 = vrot.slane %v781_v28, 4  ;;  %v742_v19 = vpop.f32.mrb[9].mxu0  ;;  %v2430_v24 = vpop.f32.mrb[9].mxu1  ;;  %v790_v37 = vrot.slane %v740_v36, 4 }
 0x699   :  { %v744_v29 = vpop.f32.mrb[10].mxu0  ;;  %v784_v31 = vpop.f32.mrb[10].mxu1  ;;  %v791_v56 = vrot.slane %v742_v19, 4 }
 0x69a   :  { %v798_v32 = vadd.f32 %v792_v48, %v701_v27  ;;  %v745_v33 = vpop.f32.mrb[11].mxu0  ;;  %v2431_v34 = vpop.f32.mrb[11].mxu1  ;;  %v796_v40 = vadd.f32 %v790_v37, %v699_v38 }
 0x69b   :  { %v797_v41 = vadd.f32 %v791_v56, %v700_v58  ;;  %v821_v28 = vpop.permute.xlu0 %820 }
 0x69c   :  { %2653 = vtanh.f32 %v798_v32  ;;  %v2262_v42 = vmul.f32 -1.442695, %v796_v40  ;;  %v2264_v34 = vmul.f32 -1.442695, %v798_v32 }
 0x69d   :  { %v2263_v1 = vmul.f32 -1.442695, %v797_v41 }
 0x69e   :  { %2655 = vpow2.f32 %v2262_v42 }
 0x6a6   :  { %v2654_v35 = vpop.eup %2653 }
 0x6a7   :  { %826 = vrot.lane.b32.xlu1 %v2654_v35, %s2849_s2 }
 0x6a8   :  { %v2656_v57 = vpop.eup %2655 }
 0x6a9   :  { %v808_v46 = vadd.f32 1.0, %v2656_v57 }
 0x6ab   :  { %2657 = vrcp.f32 %v808_v46 }
 0x6ac   :  { %2659 = vpow2.f32 %v2263_v1 }
 0x6b5   :  { %v2658_v49 = vpop.eup %2657 }
 0x6b6   :  { %v2660_v18 = vpop.eup %2659  ;;  %v823_v48 = vmul.f32 %v2658_v49, %v821_v28 }
 0x6b7   :  { %v809_v0 = vadd.f32 1.0, %v2660_v18 }
 0x6b9   :  { %2661 = vrcp.f32 %v809_v0 }
 0x6c3   :  { %v2662_v36 = vpop.eup %2661 }
 0x6c4   :  { %v824_v24 = vmul.f32 %v2662_v36, %v821_v28 }
 0x719   :  { %v827_v54 = vpop.permute.xlu1 %826 }
 0x71a   :  { %v829_v50 = vmul.f32 %v2658_v49, %v827_v54 }
 0x71c   :  { %831 = vrot.lane.b32.xlu1 %v829_v50, %s2849_s2 }
 0x78e   :  { %v832_v27 = vpop.permute.xlu1 %831 }
 0x78f   :  { %v3215_v29 = vadd.f32 %v832_v27, %v823_v48  ;;  %v3217_v31 = vadd.f32 %v832_v27, %v824_v24  ;;  %v852_v48 = vld [vmem:[#allocation2 + $0x8] sm:$0xc0] }
 0x791   :  { %2663 = vtanh.f32 %v3215_v29 }
 0x792   :  { %2665 = vtanh.f32 %v3217_v31 }
 0x793   :  { %2667 = vpow2.f32 %v2264_v34 }
 0x79b   :  { %v2664_v19 = vpop.eup %2663 }
 0x79c   :  { %v2666_v33 = vpop.eup %2665  ;;  %840 = vrot.lane.b32.xlu0 %v2664_v19, %s2849_s2 }
 0x79d   :  { %842 = vrot.lane.b32.xlu1 %v2666_v33, %s2849_s2  ;;  %v2668_v35 = vpop.eup %2667 }
 0x79e   :  { %v810_v37 = vadd.f32 1.0, %v2668_v35  ;;  %v983_v35 = vrot.slane %v3215_v29, 6 }
 0x7a0   :  { %2669 = vrcp.f32 %v810_v37  ;;  %v984_v37 = vrot.slane %v3217_v31, 6 }
 0x7aa   :  { %v2670_v40 = vpop.eup %2669 }
 0x80e   :  { %v841_v38 = vpop.permute.xlu0 %840 }
 0x80f   :  { %v843_v42 = vpop.permute.xlu1 %842 }
 0x810   :  { %v844_v57 = vsel %vm367_vm1, %v841_v38, %v843_v42  ;;  %v848_v46 = vmul.f32 %v2670_v40, %v843_v42 }
 0x811   :  { %v847_v49 = vmul.f32 %v2662_v36, %v844_v57 }
 0x812   :  { %850 = vst.msk [vmem:[#allocation3 - $0x4] sm:$0x30] %vm849_vm6, %v848_v46  ;;  %v855_v54 = vpack.c.bf16 %v848_v46, %v848_v46 }
 0x813   :  { %v854_v50 = vpack.c.bf16 %v847_v49, %v847_v49 }
 0x814   :  { %v859_v56 = vrot.slane %v855_v54, 2 }
 0x815   :  { %v858_v58 = vrot.slane %v854_v50, 2 }
 0x816   :  { %862 = vrot.lane.b32.xlu1 %v859_v56, %s2851_s27 }
 0x817   :  { %860 = vrot.lane.b32.xlu0 %v858_v58, %s2851_s27 }
 0x888   :  { %v863_v32 = vpop.permute.xlu1 %862 }
 0x889   :  { %v861_v41 = vpop.permute.xlu0 %860 }
 0x88a   :  { %v865_v1 = vsel %vm511_vm2, %v861_v41, %v863_v32 }
 0x88b   :  { %2265 = vmatmul.mubr.msk.bf16.vlgmr.msra.gmra.mrb[12].mxu0 %vm367_vm1, %v865_v1  ;;  %2445 = vmatmul.mubr.msk.bf16.vlgmr.msra.gmra.mrb[12].mxu1 %vm367_vm1, %v865_v1 }
 0x88c   :  { %1033 = vmatpush1.bf16.msra.mxu0 %v2962_v7  ;;  %2449 = vmatpush3.bf16.msra.mxu1 %v2959_v6 }
 0x88d   :  { %1034 = vmatprep.subr.bf16.mxu0 %v2965_v8  ;;  %2450 = vmatprep.subr.bf16.mxu1 %v2844_v2 }
 0x88e   :  { %1064 = vmatprep.mubr.bf16.mxu0 %v2846_v3  ;;  %2460 = vmatprep.mubr.msk.bf16.mxu1 %vm2845_vm0, %v2844_v2 }
 0x890   :  { %1035 = vmatpush1.bf16.msra.mxu0 %v2971_v10  ;;  %2451 = vmatpush3.bf16.msra.mxu1 %v2969_v9 }
 0x891   :  { %1036 = vmatprep.subr.bf16.mxu0 %v2974_v11  ;;  %2452 = vmatprep.subr.bf16.mxu1 %v2844_v2  ;;  %v853_v11 = vld [vmem:[#allocation2 + $0x10] sm:$0xc0] }
 0x894   :  { %1037 = vmatpush1.bf16.msra.mxu0 %v2981_v13  ;;  %2453 = vmatpush3.bf16.msra.mxu1 %v2977_v12 }
 0x895   :  { %1038 = vmatprep.subr.bf16.mxu0 %v2984_v14  ;;  %2454 = vmatprep.subr.bf16.mxu1 %v2844_v2 }
 0x898   :  { %1039 = vmatpush1.bf16.msra.mxu0 %v2991_v16  ;;  %2455 = vmatpush3.bf16.msra.mxu1 %v2987_v15 }
 0x899   :  { %1040 = vmatprep.subr.bf16.mxu0 %v2994_v17  ;;  %2456 = vmatprep.subr.bf16.mxu1 %v2844_v2 }
 0x89c   :  { %1041 = vmatpush1.bf16.msra.mxu0 %v3005_v21  ;;  %2457 = vmatpush3.bf16.msra.mxu1 %v3003_v20  ;;  %v851_v21 = vld [vmem:[#allocation2] sm:$0xc0] }
 0x89d   :  { %1042 = vmatprep.subr.bf16.mxu0 %v3012_v23  ;;  %2458 = vmatprep.subr.bf16.mxu1 %v2844_v2 }
 0x8a0   :  { %1043 = vmatpush1.bf16.msra.mxu0 %v3020_v26  ;;  %2459 = vmatpush3.bf16.msra.mxu1 %v3016_v25 }
 0x8a1   :  { %1184 = vmatprep.subr.bf16.mxu0 %v2957_v5  ;;  %2464 = vmatprep.subr.bf16.mxu1 %v2844_v2 }
 0x95e   :  { %v903_v6 = vpop.f32.mrb[12].mxu0  ;;  %v944_v7 = vpop.f32.mrb[12].mxu1 }
 0x95f   :  { %v955_v8 = vrot.slane %v944_v7, 2  ;;  %v905_v9 = vpop.f32.mrb[13].mxu0  ;;  %v2446_v10 = vpop.f32.mrb[13].mxu1  ;;  %v953_v20 = vrot.slane %v903_v6, 2 }
 0x960   :  { %v907_v12 = vpop.f32.mrb[14].mxu0  ;;  %v947_v13 = vpop.f32.mrb[14].mxu1  ;;  %v954_v28 = vrot.slane %v905_v9, 2 }
 0x961   :  { %v961_v14 = vadd.f32 %v955_v8, %v853_v11  ;;  %v908_v15 = vpop.f32.mrb[15].mxu0  ;;  %v2447_v16 = vpop.f32.mrb[15].mxu1  ;;  %v959_v5 = vadd.f32 %v953_v20, %v851_v21  ;;  %v73_v11 = vunpack.c.h.bf16 %v3007_v22  ;;  %v3282_v22 = vld [vmem:[#allocation6 + $0x8] ss:$12 sps:$4 sm:$0xff]   ;;  %v3302_v21 = vld [vmem:[#allocation6 + $0x30] ss:$12 sps:$4 sm:$0xff]  }
 0x962   :  { %v960_v24 = vadd.f32 %v954_v28, %v852_v48  ;;  %v3279_v15 = vld [vmem:[#allocation6] ss:$12 sps:$4 sm:$0xff]   ;;  %v3292_v16 = vld [vmem:[#allocation6 + $0x18] ss:$12 sps:$4 sm:$0xff]  }
 0x963   :  { %2671 = vtanh.f32 %v961_v14  ;;  %v2267_v23 = vmul.f32 -1.442695, %v959_v5  ;;  %v2269_v29 = vmul.f32 -1.442695, %v961_v14  ;;  %v3298_v20 = vld [vmem:[#allocation6 + $0x34] ss:$12 sps:$4 sm:$0xff]  }
 0x964   :  { %v2268_v27 = vmul.f32 -1.442695, %v960_v24  ;;  %v3305_v5 = vld [vmem:[#allocation6 + $0x38] ss:$12 sps:$4 sm:$0xff]  }
 0x965   :  { %2673 = vpow2.f32 %v2267_v23  ;;  %v3308_v23 = vld [vmem:[#allocation6 + $0x4c] ss:$12 sps:$4 sm:$0xff]  }
 0x96d   :  { %v2672_v17 = vpop.eup %2671 }
 0x96e   :  { %990 = vrot.lane.b32.xlu0 %v2672_v17, %s2849_s2  ;;  %v3295_v17 = vld [vmem:[#allocation6 + $0x20] ss:$12 sps:$4 sm:$0xff]  }
 0x96f   :  { %v2674_v25 = vpop.eup %2673 }
 0x970   :  { %v971_v26 = vadd.f32 1.0, %v2674_v25  ;;  %v3312_v25 = vld [vmem:[#allocation6 + $0x48] ss:$12 sps:$4 sm:$0xff]  }
 0x972   :  { %2675 = vrcp.f32 %v971_v26  ;;  %v3315_v26 = vld [vmem:[#allocation6 + $0x50] ss:$12 sps:$4 sm:$0xff]  }
 0x973   :  { %2677 = vpow2.f32 %v2268_v27 }
 0x97c   :  { %v2676_v18 = vpop.eup %2675 }
 0x97d   :  { %v2678_v19 = vpop.eup %2677  ;;  %v987_v38 = vmul.f32 %v2676_v18, %v983_v35  ;;  %v3331_v35 = vld [vmem:[#allocation6 + $0x68] ss:$12 sps:$4 sm:$0xff]  }
 0x97e   :  { %v972_v33 = vadd.f32 1.0, %v2678_v19 }
 0x980   :  { %2679 = vrcp.f32 %v972_v33 }
 0x98a   :  { %v2680_v34 = vpop.eup %2679 }
 0x98b   :  { %v988_v40 = vmul.f32 %v2680_v34, %v984_v37  ;;  %v3337_v37 = vld [vmem:[#allocation6 + $0x7c] ss:$12 sps:$4 sm:$0xff]  }
 0x9e0   :  { %v991_v0 = vpop.permute.xlu0 %990 }
 0x9e1   :  { %v993_v36 = vmul.f32 %v2676_v18, %v991_v0  ;;  %v3318_v0 = vld [vmem:[#allocation6 + $0x64] ss:$12 sps:$4 sm:$0xff]  }
 0x9e3   :  { %995 = vrot.lane.b32.xlu1 %v993_v36, %s2849_s2 }
 0xa55   :  { %v996_v42 = vpop.permute.xlu1 %995 }
 0xa56   :  { %v3261_v57 = vadd.f32 %v996_v42, %v987_v38  ;;  %v3263_v46 = vadd.f32 %v996_v42, %v988_v40 }
 0xa58   :  { %2681 = vtanh.f32 %v3261_v57 }
 0xa59   :  { %2683 = vtanh.f32 %v3263_v46 }
 0xa5a   :  { %2685 = vpow2.f32 %v2269_v29 }
 0xa62   :  { %v2682_v49 = vpop.eup %2681 }
 0xa63   :  { %v2684_v54 = vpop.eup %2683  ;;  %1004 = vrot.lane.b32.xlu0 %v2682_v49, %s2849_s2  ;;  %v3344_v49 = vld [vmem:[#allocation6 + $0x78] ss:$12 sps:$4 sm:$0xff]  }
 0xa64   :  { %1006 = vrot.lane.b32.xlu1 %v2684_v54, %s2849_s2  ;;  %v2686_v31 = vpop.eup %2685  ;;  %v3350_v54 = vld [vmem:[#allocation6 + $0x4] ss:$12 sps:$4 sm:$0xff]  }
 0xa65   :  { %v973_v50 = vadd.f32 1.0, %v2686_v31 }
 0xa67   :  { %2687 = vrcp.f32 %v973_v50 }
 0xa71   :  { %v2688_v58 = vpop.eup %2687 }
 0xad5   :  { %v1005_v56 = vpop.permute.xlu0 %1004 }
 0xad6   :  { %v1007_v32 = vpop.permute.xlu1 %1006 }
 0xad7   :  { %v1008_v41 = vsel %vm367_vm1, %v1005_v56, %v1007_v32  ;;  %v1012_v1 = vmul.f32 %v2688_v58, %v1007_v32 }
 0xad8   :  { %v1011_v6 = vmul.f32 %v2680_v34, %v1008_v41  ;;  %v3328_v34 = vld [vmem:[#allocation6 + $0x60] ss:$12 sps:$4 sm:$0xff]  }
 0xad9   :  { %1014 = vst.msk [vmem:[#allocation3 - $0x4] sm:$0xc0] %vm1013_vm7, %v1012_v1  ;;  %v1019_v7 = vpack.c.bf16 %v1012_v1, %v1012_v1 }
 0xada   :  { %v1018_v8 = vpack.c.bf16 %v1011_v6, %v1011_v6 }
 0xadb   :  { %v1023_v9 = vrot.slane %v1019_v7, 3 }
 0xadc   :  { %v1022_v10 = vrot.slane %v1018_v8, 3 }
 0xadd   :  { %1026 = vrot.lane.b32.xlu1 %v1023_v9, %s2851_s27 }
 0xade   :  { %1024 = vrot.lane.b32.xlu0 %v1022_v10, %s2851_s27 }
 0xae1   :  { %149 = vperm.xlu1 %2578, %v73_v11  }
 0xae2   :  { %84 = vperm.xlu0 %2577, %v73_v11  }
 0xae5   :  { %2579 = vset.pattern.permute.xlu1 %v2847_v4  ;;  %v3285_v4 = vld [vmem:[#allocation6 + $0x1c] ss:$12 sps:$4 sm:$0xff]  }
 0xae6   :  { %196 = vperm.xlu1 %2579, %v73_v11  }
 0xaea   :  { %2590 = vset.pattern.permute.xlu1 %v2846_v3 }
 0xb4f   :  { %v1027_v12 = vpop.permute.xlu1 %1026 }
 0xb50   :  { %v1025_v13 = vpop.permute.xlu0 %1024 }
 0xb51   :  { %v1028_v14 = vsel %vm511_vm2, %v1025_v13, %v1027_v12 }
 0xb52   :  { %2270 = vmatmul.mubr.msk.bf16.vlgmr.msra.gmra.mrb[16].mxu0 %vm367_vm1, %v1028_v14  ;;  %2461 = vmatmul.mubr.msk.bf16.vlgmr.msra.gmra.mrb[16].mxu1 %vm367_vm1, %v1028_v14 }
 0xb53   :  { %1185 = vmatpush1.bf16.msra.mxu0 %v3279_v15  ;;  %2465 = vmatpush3.bf16.msra.mxu1 %v3282_v22 }
 0xb54   :  { %1186 = vmatprep.subr.bf16.mxu0 %v3285_v4  ;;  %2466 = vmatprep.subr.bf16.mxu1 %v2844_v2 }
 0xb55   :  { %1216 = vmatprep.mubr.bf16.mxu0 %v2846_v3  ;;  %2476 = vmatprep.mubr.msk.bf16.mxu1 %vm2845_vm0, %v2844_v2 }
 0xb57   :  { %1187 = vmatpush1.bf16.msra.mxu0 %v3292_v16  ;;  %2467 = vmatpush3.bf16.msra.mxu1 %v3295_v17 }
 0xb58   :  { %1188 = vmatprep.subr.bf16.mxu0 %v3298_v20  ;;  %2468 = vmatprep.subr.bf16.mxu1 %v2844_v2 }
 0xb5b   :  { %1189 = vmatpush1.bf16.msra.mxu0 %v3302_v21  ;;  %2469 = vmatpush3.bf16.msra.mxu1 %v3305_v5 }
 0xb5c   :  { %1190 = vmatprep.subr.bf16.mxu0 %v3308_v23  ;;  %2470 = vmatprep.subr.bf16.mxu1 %v2844_v2 }
 0xb5f   :  { %1191 = vmatpush1.bf16.msra.mxu0 %v3312_v25  ;;  %2471 = vmatpush3.bf16.msra.mxu1 %v3315_v26 }
 0xb60   :  { %v150_v18 = vpop.permute.xlu1 %149  ;;  %1192 = vmatprep.subr.bf16.mxu0 %v3318_v0  ;;  %2472 = vmatprep.subr.bf16.mxu1 %v2844_v2 }
 0xb61   :  { %v182_v36 = vmul.f32 %v3100_v60, %v150_v18  ;;  %v183_v28 = vmul.f32 %v3103_v61, %v150_v18  ;;  %v85_v48 = vpop.permute.xlu0 %84  ;;  %v184_v24 = vmul.f32 %v3106_v62, %v150_v18 }
 0xb62   :  { %v119_v27 = vmul.f32 %v3074_v43, %v85_v48  ;;  %v120_v19 = vmul.f32 %v3077_v44, %v85_v48  ;;  %v121_v33 = vmul.f32 %v3080_v45, %v85_v48 }
 0xb63   :  { %1193 = vmatpush1.bf16.msra.mxu0 %v3328_v34  ;;  %2473 = vmatpush3.bf16.msra.mxu1 %v3331_v35 }
 0xb64   :  { %v141_v60 = vadd.f32 %v3085_v51, %v119_v27  ;;  %v142_v61 = vadd.f32 %v3088_v52, %v120_v19  ;;  %v143_v62 = vadd.f32 %v3090_v53, %v121_v33  ;;  %1194 = vmatprep.subr.bf16.mxu0 %v3337_v37  ;;  %2474 = vmatprep.subr.bf16.mxu1 %v2844_v2  ;;  %v3347_v52 = vld [vmem:[#allocation6 + $0x80] ss:$12 sps:$4 sm:$0xff]   ;;  %v1137_v33 = vrot.slane %v3261_v57, 6 }
 0xb65   :  { %v197_v43 = vpop.permute.xlu1 %196 }
 0xb66   :  { %v188_v44 = vadd.f32 %v182_v36, %v141_v60  ;;  %v189_v45 = vadd.f32 %v183_v28, %v142_v61  ;;  %v190_v38 = vadd.f32 %v184_v24, %v143_v62  ;;  %v229_v40 = vmul.f32 %v3092_v55, %v197_v43 }
 0xb67   :  { %v230_v42 = vmul.f32 %v3097_v59, %v197_v43  ;;  %v231_v51 = vmul.f32 %v3108_v63, %v197_v43  ;;  %1195 = vmatpush1.bf16.msra.mxu0 %v3344_v49  ;;  %2475 = vmatpush3.bf16.msra.mxu1 %v3347_v52  ;;  %v1138_v60 = vrot.slane %v3263_v46, 6 }
 0xb68   :  { %v235_v53 = vadd.f32 %v229_v40, %v188_v44  ;;  %1347 = vmatprep.subr.bf16.mxu0 %v3350_v54  ;;  %2480 = vmatprep.subr.bf16.mxu1 %v2844_v2 }
 0xb69   :  { %v236_v55 = vadd.f32 %v230_v42, %v189_v45  ;;  %v237_v29 = vadd.f32 %v231_v51, %v190_v38 }
 0xb6a   :  { %241 = vst [vmem:[#allocation2 + $0x18] sm:$0xff] %v235_v53 }
 0xb6b   :  { %242 = vst [vmem:[#allocation2 + $0x20] sm:$0xff] %v236_v55  ;;  %243 = vst [vmem:[#allocation2 + $0x28] sm:$0xff] %v237_v29 }
 0xb71   :  { %v1015_v8 = vld [vmem:[#allocation2 + $0x18] sm:$0x3] }
 0xb72   :  { %v1017_v63 = vld [vmem:[#allocation2 + $0x28] sm:$0x3]  ;;  %v1016_v36 = vld [vmem:[#allocation2 + $0x20] sm:$0x3] }
 0xc25   :  { %v1066_v59 = vpop.f32.mrb[16].mxu0  ;;  %v1107_v31 = vpop.f32.mrb[16].mxu1 }
 0xc26   :  { %v1115_v50 = vadd.f32 %v1107_v31, %v1017_v63  ;;  %v1068_v56 = vpop.f32.mrb[17].mxu0  ;;  %v2462_v58 = vpop.f32.mrb[17].mxu1  ;;  %v1113_v9 = vadd.f32 %v1066_v59, %v1015_v8 }
 0xc27   :  { %v1070_v32 = vpop.f32.mrb[18].mxu0  ;;  %v1110_v41 = vpop.f32.mrb[18].mxu1  ;;  %v1114_v28 = vadd.f32 %v1068_v56, %v1016_v36 }
 0xc28   :  { %2689 = vtanh.f32 %v1115_v50  ;;  %v1071_v1 = vpop.f32.mrb[19].mxu0  ;;  %v2463_v6 = vpop.f32.mrb[19].mxu1  ;;  %v2272_v10 = vmul.f32 -1.442695, %v1113_v9  ;;  %v2274_v57 = vmul.f32 -1.442695, %v1115_v50 }
 0xc29   :  { %v2273_v48 = vmul.f32 -1.442695, %v1114_v28  ;;  %v1171_v9 = vld [vmem:[#allocation2 + $0x28] sm:$0xc]  ;;  %v1169_v28 = vld [vmem:[#allocation2 + $0x18] sm:$0xc] }
 0xc2a   :  { %2691 = vpow2.f32 %v2272_v10 }
 0xc32   :  { %v2690_v7 = vpop.eup %2689 }
 0xc33   :  { %1144 = vrot.lane.b32.xlu0 %v2690_v7, %s2849_s2 }
 0xc34   :  { %v2692_v11 = vpop.eup %2691 }
 0xc35   :  { %v1125_v12 = vadd.f32 1.0, %v2692_v11 }
 0xc37   :  { %2693 = vrcp.f32 %v1125_v12 }
 0xc38   :  { %2695 = vpow2.f32 %v2273_v48 }
 0xc41   :  { %v2694_v13 = vpop.eup %2693 }
 0xc42   :  { %v2696_v24 = vpop.eup %2695  ;;  %v1141_v61 = vmul.f32 %v2694_v13, %v1137_v33 }
 0xc43   :  { %v1126_v27 = vadd.f32 1.0, %v2696_v24 }
 0xc45   :  { %2697 = vrcp.f32 %v1126_v27 }
 0xc4f   :  { %v2698_v19 = vpop.eup %2697 }
 0xc50   :  { %v1142_v62 = vmul.f32 %v2698_v19, %v1138_v60 }
 0xca5   :  { %v1145_v14 = vpop.permute.xlu0 %1144 }
 0xca6   :  { %v1147_v18 = vmul.f32 %v2694_v13, %v1145_v14 }
 0xca8   :  { %1149 = vrot.lane.b32.xlu1 %v1147_v18, %s2849_s2 }
 0xd1a   :  { %v1150_v43 = vpop.permute.xlu1 %1149 }
 0xd1b   :  { %v3358_v44 = vadd.f32 %v1150_v43, %v1141_v61  ;;  %v3360_v45 = vadd.f32 %v1150_v43, %v1142_v62  ;;  %v1170_v43 = vld [vmem:[#allocation2 + $0x20] sm:$0xc] }
 0xd1d   :  { %2699 = vtanh.f32 %v3358_v44 }
 0xd1e   :  { %2701 = vtanh.f32 %v3360_v45 }
 0xd1f   :  { %2703 = vpow2.f32 %v2274_v57 }
 0xd27   :  { %v2700_v38 = vpop.eup %2699 }
 0xd28   :  { %v2702_v40 = vpop.eup %2701  ;;  %1158 = vrot.lane.b32.xlu0 %v2700_v38, %s2849_s2 }
 0xd29   :  { %1160 = vrot.lane.b32.xlu1 %v2702_v40, %s2849_s2  ;;  %v2704_v46 = vpop.eup %2703 }
 0xd2a   :  { %v1127_v42 = vadd.f32 1.0, %v2704_v46 }
 0xd2c   :  { %2705 = vrcp.f32 %v1127_v42 }
 0xd36   :  { %v2706_v53 = vpop.eup %2705 }
 0xd9a   :  { %v1159_v51 = vpop.permute.xlu0 %1158 }
 0xd9b   :  { %v1161_v55 = vpop.permute.xlu1 %1160 }
 0xd9c   :  { %v1162_v29 = vsel %vm367_vm1, %v1159_v51, %v1161_v55  ;;  %v1166_v59 = vmul.f32 %v2706_v53, %v1161_v55  ;;  %v1298_v51 = vrot.slane %v3358_v44, 6  ;;  %v1299_v53 = vrot.slane %v3360_v45, 6 }
 0xd9d   :  { %v1165_v63 = vmul.f32 %v2698_v19, %v1162_v29 }
 0xd9e   :  { %1168 = vst.msk [vmem:[#allocation3 + $0x4] sm:$0x3] %vm1167_vm8, %v1166_v59  ;;  %v1173_v31 = vpack.c.bf16 %v1166_v59, %v1166_v59 }
 0xd9f   :  { %v1172_v56 = vpack.c.bf16 %v1165_v63, %v1165_v63 }
 0xda0   :  { %1178 = vrot.lane.b32.xlu1 %v1173_v31, %s2851_s27 }
 0xda1   :  { %1176 = vrot.lane.b32.xlu0 %v1172_v56, %s2851_s27 }
 0xe12   :  { %v1179_v50 = vpop.permute.xlu1 %1178 }
 0xe13   :  { %v1177_v58 = vpop.permute.xlu0 %1176 }
 0xe14   :  { %v1180_v32 = vsel %vm511_vm2, %v1177_v58, %v1179_v50 }
 0xe15   :  { %2275 = vmatmul.mubr.msk.bf16.vlgmr.msra.gmra.mrb[20].mxu0 %vm367_vm1, %v1180_v32  ;;  %2477 = vmatmul.mubr.msk.bf16.vlgmr.msra.gmra.mrb[20].mxu1 %vm367_vm1, %v1180_v32 }
 0xe16   :  { %1348 = vmatpush1.bf16.msra.mxu0 %v3279_v15  ;;  %2481 = vmatpush3.bf16.msra.mxu1 %v3282_v22 }
 0xe17   :  { %1349 = vmatprep.subr.bf16.mxu0 %v3285_v4  ;;  %2482 = vmatprep.subr.bf16.mxu1 %v2844_v2 }
 0xe18   :  { %1379 = vmatprep.mubr.bf16.mxu0 %v2846_v3  ;;  %2492 = vmatprep.mubr.msk.bf16.mxu1 %vm2845_vm0, %v2844_v2 }
 0xe1a   :  { %1350 = vmatpush1.bf16.msra.mxu0 %v3292_v16  ;;  %2483 = vmatpush3.bf16.msra.mxu1 %v3295_v17 }
 0xe1b   :  { %1351 = vmatprep.subr.bf16.mxu0 %v3298_v20  ;;  %2484 = vmatprep.subr.bf16.mxu1 %v2844_v2 }
 0xe1e   :  { %1352 = vmatpush1.bf16.msra.mxu0 %v3302_v21  ;;  %2485 = vmatpush3.bf16.msra.mxu1 %v3305_v5 }
 0xe1f   :  { %1353 = vmatprep.subr.bf16.mxu0 %v3308_v23  ;;  %2486 = vmatprep.subr.bf16.mxu1 %v2844_v2 }
 0xe22   :  { %1354 = vmatpush1.bf16.msra.mxu0 %v3312_v25  ;;  %2487 = vmatpush3.bf16.msra.mxu1 %v3315_v26 }
 0xe23   :  { %1355 = vmatprep.subr.bf16.mxu0 %v3318_v0  ;;  %2488 = vmatprep.subr.bf16.mxu1 %v2844_v2 }
 0xe26   :  { %1356 = vmatpush1.bf16.msra.mxu0 %v3328_v34  ;;  %2489 = vmatpush3.bf16.msra.mxu1 %v3331_v35 }
 0xe27   :  { %1357 = vmatprep.subr.bf16.mxu0 %v3337_v37  ;;  %2490 = vmatprep.subr.bf16.mxu1 %v2844_v2 }
 0xe2a   :  { %1358 = vmatpush1.bf16.msra.mxu0 %v3344_v49  ;;  %2491 = vmatpush3.bf16.msra.mxu1 %v3347_v52 }
 0xe2b   :  { %1509 = vmatprep.subr.bf16.mxu0 %v3350_v54  ;;  %2496 = vmatprep.subr.bf16.mxu1 %v2844_v2 }
 0xee8   :  { %v1218_v41 = vpop.f32.mrb[20].mxu0  ;;  %v1259_v1 = vpop.f32.mrb[20].mxu1 }
 0xee9   :  { %v1270_v6 = vrot.slane %v1259_v1, 6  ;;  %v1220_v7 = vpop.f32.mrb[21].mxu0  ;;  %v2478_v8 = vpop.f32.mrb[21].mxu1  ;;  %v1268_v36 = vrot.slane %v1218_v41, 6 }
 0xeea   :  { %v1222_v10 = vpop.f32.mrb[22].mxu0  ;;  %v1262_v11 = vpop.f32.mrb[22].mxu1  ;;  %v1269_v62 = vrot.slane %v1220_v7, 6 }
 0xeeb   :  { %v1276_v12 = vadd.f32 %v1270_v6, %v1171_v9  ;;  %v1223_v13 = vpop.f32.mrb[23].mxu0  ;;  %v2479_v14 = vpop.f32.mrb[23].mxu1  ;;  %v1274_v48 = vadd.f32 %v1268_v36, %v1169_v28 }
 0xeec   :  { %v1275_v38 = vadd.f32 %v1269_v62, %v1170_v43 }
 0xeed   :  { %2707 = vtanh.f32 %v1276_v12  ;;  %v2277_v24 = vmul.f32 -1.442695, %v1274_v48  ;;  %v2279_v44 = vmul.f32 -1.442695, %v1276_v12 }
 0xeee   :  { %v2278_v40 = vmul.f32 -1.442695, %v1275_v38 }
 0xeef   :  { %2709 = vpow2.f32 %v2277_v24 }
 0xef7   :  { %v2708_v18 = vpop.eup %2707 }
 0xef8   :  { %1305 = vrot.lane.b32.xlu0 %v2708_v18, %s2849_s2 }
 0xef9   :  { %v2710_v27 = vpop.eup %2709 }
 0xefa   :  { %v1286_v19 = vadd.f32 1.0, %v2710_v27 }
 0xefc   :  { %2711 = vrcp.f32 %v1286_v19  ;;  %v1332_v19 = vld [vmem:[#allocation2 + $0x28] sm:$0x30] }
 0xefd   :  { %2713 = vpow2.f32 %v2278_v40 }
 0xf06   :  { %v2712_v33 = vpop.eup %2711 }
 0xf07   :  { %v2714_v57 = vpop.eup %2713  ;;  %v1302_v55 = vmul.f32 %v2712_v33, %v1298_v51 }
 0xf08   :  { %v1287_v46 = vadd.f32 1.0, %v2714_v57  ;;  %v1330_v57 = vld [vmem:[#allocation2 + $0x18] sm:$0x30] }
 0xf0a   :  { %2715 = vrcp.f32 %v1287_v46 }
 0xf14   :  { %v2716_v42 = vpop.eup %2715 }
 0xf15   :  { %v1303_v29 = vmul.f32 %v2716_v42, %v1299_v53 }
 0xf6a   :  { %v1306_v60 = vpop.permute.xlu0 %1305 }
 0xf6b   :  { %v1308_v61 = vmul.f32 %v2712_v33, %v1306_v60 }
 0xf6d   :  { %1310 = vrot.lane.b32.xlu1 %v1308_v61, %s2849_s2 }
 0xfdf   :  { %v1311_v59 = vpop.permute.xlu1 %1310 }
 0xfe0   :  { %v3403_v63 = vadd.f32 %v1311_v59, %v1302_v55  ;;  %v3405_v31 = vadd.f32 %v1311_v59, %v1303_v29 }
 0xfe2   :  { %2717 = vtanh.f32 %v3403_v63 }
 0xfe3   :  { %2719 = vtanh.f32 %v3405_v31 }
 0xfe4   :  { %2721 = vpow2.f32 %v2279_v44 }
 0xfec   :  { %v2718_v56 = vpop.eup %2717 }
 0xfed   :  { %v2720_v50 = vpop.eup %2719  ;;  %1319 = vrot.lane.b32.xlu0 %v2718_v56, %s2849_s2 }
 0xfee   :  { %1321 = vrot.lane.b32.xlu1 %v2720_v50, %s2849_s2  ;;  %v2722_v45 = vpop.eup %2721  ;;  %v1331_v50 = vld [vmem:[#allocation2 + $0x20] sm:$0x30] }
 0xfef   :  { %v1288_v58 = vadd.f32 1.0, %v2722_v45 }
 0xff1   :  { %2723 = vrcp.f32 %v1288_v58 }
 0xffb   :  { %v2724_v41 = vpop.eup %2723 }
0x105f   :  { %v1320_v32 = vpop.permute.xlu0 %1319 }
0x1060   :  { %v1322_v1 = vpop.permute.xlu1 %1321 }
0x1061   :  { %v1323_v6 = vsel %vm367_vm1, %v1320_v32, %v1322_v1  ;;  %v1327_v7 = vmul.f32 %v2724_v41, %v1322_v1  ;;  %v1461_v1 = vrot.slane %v3403_v63, 6 }
0x1062   :  { %v1326_v8 = vmul.f32 %v2716_v42, %v1323_v6  ;;  %v1462_v6 = vrot.slane %v3405_v31, 6 }
0x1063   :  { %1329 = vst.msk [vmem:[#allocation3 + $0x4] sm:$0xc] %vm1328_vm9, %v1327_v7  ;;  %v1334_v9 = vpack.c.bf16 %v1327_v7, %v1327_v7 }
0x1064   :  { %v1333_v10 = vpack.c.bf16 %v1326_v8, %v1326_v8 }
0x1065   :  { %v1338_v11 = vrot.slane %v1334_v9, 1 }
0x1066   :  { %v1337_v13 = vrot.slane %v1333_v10, 1 }
0x1067   :  { %1341 = vrot.lane.b32.xlu1 %v1338_v11, %s2851_s27 }
0x1068   :  { %1339 = vrot.lane.b32.xlu0 %v1337_v13, %s2851_s27 }
0x10d9   :  { %v1342_v12 = vpop.permute.xlu1 %1341 }
0x10da   :  { %v1340_v14 = vpop.permute.xlu0 %1339 }
0x10db   :  { %v1343_v18 = vsel %vm511_vm2, %v1340_v14, %v1342_v12 }
0x10dc   :  { %2280 = vmatmul.mubr.msk.bf16.vlgmr.msra.gmra.mrb[24].mxu0 %vm367_vm1, %v1343_v18  ;;  %2493 = vmatmul.mubr.msk.bf16.vlgmr.msra.gmra.mrb[24].mxu1 %vm367_vm1, %v1343_v18 }
0x10dd   :  { %1510 = vmatpush1.bf16.msra.mxu0 %v3279_v15  ;;  %2497 = vmatpush3.bf16.msra.mxu1 %v3282_v22 }
0x10de   :  { %1511 = vmatprep.subr.bf16.mxu0 %v3285_v4  ;;  %2498 = vmatprep.subr.bf16.mxu1 %v2844_v2 }
0x10df   :  { %1541 = vmatprep.mubr.bf16.mxu0 %v2846_v3  ;;  %2508 = vmatprep.mubr.msk.bf16.mxu1 %vm2845_vm0, %v2844_v2 }
0x10e1   :  { %1512 = vmatpush1.bf16.msra.mxu0 %v3292_v16  ;;  %2499 = vmatpush3.bf16.msra.mxu1 %v3295_v17 }
0x10e2   :  { %1513 = vmatprep.subr.bf16.mxu0 %v3298_v20  ;;  %2500 = vmatprep.subr.bf16.mxu1 %v2844_v2 }
0x10e5   :  { %1514 = vmatpush1.bf16.msra.mxu0 %v3302_v21  ;;  %2501 = vmatpush3.bf16.msra.mxu1 %v3305_v5 }
0x10e6   :  { %1515 = vmatprep.subr.bf16.mxu0 %v3308_v23  ;;  %2502 = vmatprep.subr.bf16.mxu1 %v2844_v2 }
0x10e9   :  { %1516 = vmatpush1.bf16.msra.mxu0 %v3312_v25  ;;  %2503 = vmatpush3.bf16.msra.mxu1 %v3315_v26 }
0x10ea   :  { %1517 = vmatprep.subr.bf16.mxu0 %v3318_v0  ;;  %2504 = vmatprep.subr.bf16.mxu1 %v2844_v2 }
0x10ed   :  { %1518 = vmatpush1.bf16.msra.mxu0 %v3328_v34  ;;  %2505 = vmatpush3.bf16.msra.mxu1 %v3331_v35 }
0x10ee   :  { %1519 = vmatprep.subr.bf16.mxu0 %v3337_v37  ;;  %2506 = vmatprep.subr.bf16.mxu1 %v2844_v2 }
0x10f1   :  { %1520 = vmatpush1.bf16.msra.mxu0 %v3344_v49  ;;  %2507 = vmatpush3.bf16.msra.mxu1 %v3347_v52 }
0x10f2   :  { %1671 = vmatprep.subr.bf16.mxu0 %v3350_v54  ;;  %2512 = vmatprep.subr.bf16.mxu1 %v2844_v2 }
0x11af   :  { %v1381_v36 = vpop.f32.mrb[24].mxu0  ;;  %v1422_v28 = vpop.f32.mrb[24].mxu1 }
0x11b0   :  { %v1433_v48 = vrot.slane %v1422_v28, 4  ;;  %v1383_v24 = vpop.f32.mrb[25].mxu0  ;;  %v2494_v27 = vpop.f32.mrb[25].mxu1  ;;  %v1431_v40 = vrot.slane %v1381_v36, 4 }
0x11b1   :  { %v1385_v33 = vpop.f32.mrb[26].mxu0  ;;  %v1425_v60 = vpop.f32.mrb[26].mxu1  ;;  %v1432_v56 = vrot.slane %v1383_v24, 4 }
0x11b2   :  { %v1439_v61 = vadd.f32 %v1433_v48, %v1332_v19  ;;  %v1386_v62 = vpop.f32.mrb[27].mxu0  ;;  %v2495_v43 = vpop.f32.mrb[27].mxu1  ;;  %v1437_v46 = vadd.f32 %v1431_v40, %v1330_v57 }
0x11b3   :  { %v1438_v44 = vadd.f32 %v1432_v56, %v1331_v50 }
0x11b4   :  { %2725 = vtanh.f32 %v1439_v61  ;;  %v2282_v42 = vmul.f32 -1.442695, %v1437_v46  ;;  %v2284_v63 = vmul.f32 -1.442695, %v1439_v61 }
0x11b5   :  { %v2283_v45 = vmul.f32 -1.442695, %v1438_v44 }
0x11b6   :  { %2727 = vpow2.f32 %v2282_v42 }
0x11be   :  { %v2726_v38 = vpop.eup %2725 }
0x11bf   :  { %1468 = vrot.lane.b32.xlu0 %v2726_v38, %s2849_s2 }
0x11c0   :  { %v2728_v51 = vpop.eup %2727 }
0x11c1   :  { %v1449_v53 = vadd.f32 1.0, %v2728_v51 }
0x11c3   :  { %2729 = vrcp.f32 %v1449_v53  ;;  %v1494_v53 = vld [vmem:[#allocation2 + $0x28] sm:$0xc0] }
0x11c4   :  { %2731 = vpow2.f32 %v2283_v45 }
0x11cd   :  { %v2730_v55 = vpop.eup %2729 }
0x11ce   :  { %v2732_v58 = vpop.eup %2731  ;;  %v1465_v7 = vmul.f32 %v2730_v55, %v1461_v1 }
0x11cf   :  { %v1450_v32 = vadd.f32 1.0, %v2732_v58  ;;  %v1492_v58 = vld [vmem:[#allocation2 + $0x18] sm:$0xc0] }
0x11d1   :  { %2733 = vrcp.f32 %v1450_v32 }
0x11db   :  { %v2734_v41 = vpop.eup %2733 }
0x11dc   :  { %v1466_v8 = vmul.f32 %v2734_v41, %v1462_v6 }
0x1231   :  { %v1469_v29 = vpop.permute.xlu0 %1468 }
0x1232   :  { %v1471_v59 = vmul.f32 %v2730_v55, %v1469_v29 }
0x1234   :  { %1473 = vrot.lane.b32.xlu1 %v1471_v59, %s2849_s2 }
0x12a6   :  { %v1474_v9 = vpop.permute.xlu1 %1473 }
0x12a7   :  { %v3448_v10 = vadd.f32 %v1474_v9, %v1465_v7  ;;  %v3450_v11 = vadd.f32 %v1474_v9, %v1466_v8 }
0x12a9   :  { %2735 = vtanh.f32 %v3448_v10 }
0x12aa   :  { %2737 = vtanh.f32 %v3450_v11 }
0x12ab   :  { %2739 = vpow2.f32 %v2284_v63 }
0x12b3   :  { %v2736_v13 = vpop.eup %2735 }
0x12b4   :  { %v2738_v12 = vpop.eup %2737  ;;  %1482 = vrot.lane.b32.xlu0 %v2736_v13, %s2849_s2  ;;  %v1493_v13 = vld [vmem:[#allocation2 + $0x20] sm:$0xc0] }
0x12b5   :  { %1484 = vrot.lane.b32.xlu1 %v2738_v12, %s2849_s2  ;;  %v2740_v31 = vpop.eup %2739 }
0x12b6   :  { %v1451_v14 = vadd.f32 1.0, %v2740_v31 }
0x12b8   :  { %2741 = vrcp.f32 %v1451_v14 }
0x12c2   :  { %v2742_v36 = vpop.eup %2741 }
0x1326   :  { %v1483_v18 = vpop.permute.xlu0 %1482 }
0x1327   :  { %v1485_v28 = vpop.permute.xlu1 %1484 }
0x1328   :  { %v1486_v48 = vsel %vm367_vm1, %v1483_v18, %v1485_v28  ;;  %v1490_v24 = vmul.f32 %v2742_v36, %v1485_v28  ;;  %v1623_v36 = vrot.slane %v3448_v10, 6  ;;  %v1624_v28 = vrot.slane %v3450_v11, 6 }
0x1329   :  { %v1489_v27 = vmul.f32 %v2734_v41, %v1486_v48 }
0x132a   :  { %1491 = vst.msk [vmem:[#allocation3 + $0x4] sm:$0x30] %vm849_vm6, %v1490_v24  ;;  %v1496_v19 = vpack.c.bf16 %v1490_v24, %v1490_v24 }
0x132b   :  { %v1495_v33 = vpack.c.bf16 %v1489_v27, %v1489_v27 }
0x132c   :  { %v1500_v60 = vrot.slane %v1496_v19, 2 }
0x132d   :  { %v1499_v62 = vrot.slane %v1495_v33, 2 }
0x132e   :  { %1503 = vrot.lane.b32.xlu1 %v1500_v60, %s2851_s27 }
0x132f   :  { %1501 = vrot.lane.b32.xlu0 %v1499_v62, %s2851_s27 }
0x13a0   :  { %v1504_v61 = vpop.permute.xlu1 %1503 }
0x13a1   :  { %v1502_v43 = vpop.permute.xlu0 %1501 }
0x13a2   :  { %v1505_v38 = vsel %vm511_vm2, %v1502_v43, %v1504_v61 }
0x13a3   :  { %2285 = vmatmul.mubr.msk.bf16.vlgmr.msra.gmra.mrb[28].mxu0 %vm367_vm1, %v1505_v38  ;;  %2509 = vmatmul.mubr.msk.bf16.vlgmr.msra.gmra.mrb[28].mxu1 %vm367_vm1, %v1505_v38 }
0x13a4   :  { %1672 = vmatpush1.bf16.msra.mxu0 %v3279_v15  ;;  %2513 = vmatpush3.bf16.msra.mxu1 %v3282_v22 }
0x13a5   :  { %1673 = vmatprep.subr.bf16.mxu0 %v3285_v4  ;;  %2514 = vmatprep.subr.bf16.mxu1 %v2844_v2 }
0x13a6   :  { %1703 = vmatprep.mubr.bf16.mxu0 %v2846_v3  ;;  %2524 = vmatprep.mubr.msk.bf16.mxu1 %vm2845_vm0, %v2844_v2 }
0x13a8   :  { %1674 = vmatpush1.bf16.msra.mxu0 %v3292_v16  ;;  %2515 = vmatpush3.bf16.msra.mxu1 %v3295_v17 }
0x13a9   :  { %1675 = vmatprep.subr.bf16.mxu0 %v3298_v20  ;;  %2516 = vmatprep.subr.bf16.mxu1 %v2844_v2 }
0x13ac   :  { %1676 = vmatpush1.bf16.msra.mxu0 %v3302_v21  ;;  %2517 = vmatpush3.bf16.msra.mxu1 %v3305_v5 }
0x13ad   :  { %1677 = vmatprep.subr.bf16.mxu0 %v3308_v23  ;;  %2518 = vmatprep.subr.bf16.mxu1 %v2844_v2 }
0x13b0   :  { %1678 = vmatpush1.bf16.msra.mxu0 %v3312_v25  ;;  %2519 = vmatpush3.bf16.msra.mxu1 %v3315_v26 }
0x13b1   :  { %1679 = vmatprep.subr.bf16.mxu0 %v3318_v0  ;;  %2520 = vmatprep.subr.bf16.mxu1 %v2844_v2 }
0x13b4   :  { %1680 = vmatpush1.bf16.msra.mxu0 %v3328_v34  ;;  %2521 = vmatpush3.bf16.msra.mxu1 %v3331_v35 }
0x13b5   :  { %1681 = vmatprep.subr.bf16.mxu0 %v3337_v37  ;;  %2522 = vmatprep.subr.bf16.mxu1 %v2844_v2 }
0x13b8   :  { %1682 = vmatpush1.bf16.msra.mxu0 %v3344_v49  ;;  %2523 = vmatpush3.bf16.msra.mxu1 %v3347_v52 }
0x13b9   :  { %1862 = vmatprep.subr.bf16.mxu0 %v3350_v54  ;;  %2528 = vmatprep.subr.bf16.mxu1 %v2844_v2 }
0x1476   :  { %v1543_v40 = vpop.f32.mrb[28].mxu0  ;;  %v1584_v57 = vpop.f32.mrb[28].mxu1 }
0x1477   :  { %v1595_v46 = vrot.slane %v1584_v57, 2  ;;  %v1545_v42 = vpop.f32.mrb[29].mxu0  ;;  %v2510_v51 = vpop.f32.mrb[29].mxu1  ;;  %v1593_v45 = vrot.slane %v1543_v40, 2 }
0x1478   :  { %v1547_v55 = vpop.f32.mrb[30].mxu0  ;;  %v1587_v29 = vpop.f32.mrb[30].mxu1  ;;  %v1594_v9 = vrot.slane %v1545_v42, 2 }
0x1479   :  { %v1601_v59 = vadd.f32 %v1595_v46, %v1494_v53  ;;  %v1548_v56 = vpop.f32.mrb[31].mxu0  ;;  %v2511_v50 = vpop.f32.mrb[31].mxu1  ;;  %v1599_v54 = vadd.f32 %v1593_v45, %v1492_v58 }
0x147a   :  { %v1600_v12 = vadd.f32 %v1594_v9, %v1493_v13 }
0x147b   :  { %2743 = vtanh.f32 %v1601_v59  ;;  %v2287_v32 = vmul.f32 -1.442695, %v1599_v54  ;;  %v2289_v10 = vmul.f32 -1.442695, %v1601_v59 }
0x147c   :  { %v2288_v63 = vmul.f32 -1.442695, %v1600_v12 }
0x147d   :  { %2745 = vpow2.f32 %v2287_v32 }
0x1485   :  { %v2744_v44 = vpop.eup %2743 }
0x1486   :  { %1630 = vrot.lane.b32.xlu0 %v2744_v44, %s2849_s2 }
0x1487   :  { %v2746_v41 = vpop.eup %2745 }
0x1488   :  { %v1611_v1 = vadd.f32 1.0, %v2746_v41 }
0x148a   :  { %2747 = vrcp.f32 %v1611_v1 }
0x148b   :  { %2749 = vpow2.f32 %v2288_v63 }
0x1494   :  { %v2748_v6 = vpop.eup %2747 }
0x1495   :  { %v2750_v31 = vpop.eup %2749  ;;  %v1627_v48 = vmul.f32 %v2748_v6, %v1623_v36 }
0x1496   :  { %v1612_v14 = vadd.f32 1.0, %v2750_v31 }
0x1498   :  { %2751 = vrcp.f32 %v1612_v14 }
0x14a2   :  { %v2752_v18 = vpop.eup %2751 }
0x14a3   :  { %v1628_v24 = vmul.f32 %v2752_v18, %v1624_v28 }
0x14f8   :  { %v1631_v7 = vpop.permute.xlu0 %1630 }
0x14f9   :  { %v1633_v8 = vmul.f32 %v2748_v6, %v1631_v7  ;;  %v1655_v6 = vld [vmem:[#allocation2 + $0x20] sm:$0xc0] }
0x14fb   :  { %1635 = vrot.lane.b32.xlu1 %v1633_v8, %s2849_s2 }
0x156d   :  { %v1636_v27 = vpop.permute.xlu1 %1635 }
0x156e   :  { %v3494_v19 = vadd.f32 %v1636_v27, %v1627_v48  ;;  %v3496_v33 = vadd.f32 %v1636_v27, %v1628_v24 }
0x1570   :  { %2753 = vtanh.f32 %v3494_v19  ;;  %v1846_v27 = vrot.slane %v3496_v33, 6 }
0x1571   :  { %2755 = vtanh.f32 %v3496_v33 }
0x1572   :  { %2757 = vpow2.f32 %v2289_v10 }
0x157a   :  { %v2754_v60 = vpop.eup %2753 }
0x157b   :  { %v2756_v62 = vpop.eup %2755  ;;  %1644 = vrot.lane.b32.xlu0 %v2754_v60, %s2849_s2 }
0x157c   :  { %1646 = vrot.lane.b32.xlu1 %v2756_v62, %s2849_s2  ;;  %v2758_v11 = vpop.eup %2757 }
0x157d   :  { %v1613_v61 = vadd.f32 1.0, %v2758_v11 }
0x157f   :  { %2759 = vrcp.f32 %v1613_v61 }
0x1589   :  { %v2760_v38 = vpop.eup %2759 }
0x15ed   :  { %v1645_v43 = vpop.permute.xlu0 %1644 }
0x15ee   :  { %v1647_v40 = vpop.permute.xlu1 %1646 }
0x15ef   :  { %v1648_v57 = vsel %vm367_vm1, %v1645_v43, %v1647_v40  ;;  %v1652_v46 = vmul.f32 %v2760_v38, %v1647_v40 }
0x15f0   :  { %v1651_v42 = vmul.f32 %v2752_v18, %v1648_v57 }
0x15f1   :  { %1653 = vst.msk [vmem:[#allocation3 + $0x4] sm:$0xc0] %vm1013_vm7, %v1652_v46  ;;  %v1658_v51 = vpack.c.bf16 %v1652_v46, %v1652_v46  ;;  %v1825_v53 = vrot.slane %v1652_v46, 6 }
0x15f2   :  { %v1824_v55 = vrot.slane %v1651_v42, 6  ;;  %v1657_v29 = vpack.c.bf16 %v1651_v42, %v1651_v42 }
0x15f3   :  { %v1662_v56 = vrot.slane %v1658_v51, 3 }
0x15f4   :  { %v1661_v50 = vrot.slane %v1657_v29, 3  ;;  %v3504_v59 = vpack.i.bf16 %v1825_v53, %v1824_v55  ;;  %v1845_v53 = vrot.slane %v3494_v19, 6 }
0x15f5   :  { %1665 = vrot.lane.b32.xlu1 %v1662_v56, %s2851_s27 }
0x15f6   :  { %1663 = vrot.lane.b32.xlu0 %v1661_v50, %s2851_s27 }
0x1667   :  { %v1666_v44 = vpop.permute.xlu1 %1665 }
0x1668   :  { %v1664_v45 = vpop.permute.xlu0 %1663 }
0x1669   :  { %v1667_v58 = vsel %vm511_vm2, %v1664_v45, %v1666_v44 }
0x166a   :  { %2290 = vmatmul.mubr.msk.bf16.vlgmr.msra.gmra.mrb[32].mxu0 %vm367_vm1, %v1667_v58  ;;  %2525 = vmatmul.mubr.msk.bf16.vlgmr.msra.gmra.mrb[32].mxu1 %vm367_vm1, %v1667_v58 }
0x166b   :  { %1863 = vmatpush1.bf16.msra.mxu0 %v3279_v15  ;;  %2529 = vmatpush3.bf16.msra.mxu1 %v3282_v22 }
0x166c   :  { %1864 = vmatprep.subr.bf16.mxu0 %v3285_v4  ;;  %2530 = vmatprep.subr.bf16.mxu1 %v2844_v2 }
0x166d   :  { %1894 = vmatprep.mubr.bf16.mxu0 %v2846_v3  ;;  %2540 = vmatprep.mubr.msk.bf16.mxu1 %vm2845_vm0, %v2844_v2 }
0x166f   :  { %1865 = vmatpush1.bf16.msra.mxu0 %v3292_v16  ;;  %2531 = vmatpush3.bf16.msra.mxu1 %v3295_v17  ;;  %v1656_v17 = vld [vmem:[#allocation2 + $0x28] sm:$0xc0] }
0x1670   :  { %1866 = vmatprep.subr.bf16.mxu0 %v3298_v20  ;;  %2532 = vmatprep.subr.bf16.mxu1 %v2844_v2 }
0x1673   :  { %1867 = vmatpush1.bf16.msra.mxu0 %v3302_v21  ;;  %2533 = vmatpush3.bf16.msra.mxu1 %v3305_v5 }
0x1674   :  { %1868 = vmatprep.subr.bf16.mxu0 %v3308_v23  ;;  %2534 = vmatprep.subr.bf16.mxu1 %v2844_v2 }
0x1677   :  { %1869 = vmatpush1.bf16.msra.mxu0 %v3312_v25  ;;  %2535 = vmatpush3.bf16.msra.mxu1 %v3315_v26 }
0x1678   :  { %1870 = vmatprep.subr.bf16.mxu0 %v3318_v0  ;;  %2536 = vmatprep.subr.bf16.mxu1 %v2844_v2 }
0x167b   :  { %1871 = vmatpush1.bf16.msra.mxu0 %v3328_v34  ;;  %2537 = vmatpush3.bf16.msra.mxu1 %v3331_v35  ;;  %v1654_v34 = vld [vmem:[#allocation2 + $0x18] sm:$0xc0] }
0x167c   :  { %1872 = vmatprep.subr.bf16.mxu0 %v3337_v37  ;;  %2538 = vmatprep.subr.bf16.mxu1 %v2844_v2 }
0x167f   :  { %1873 = vmatpush1.bf16.msra.mxu0 %v3344_v49  ;;  %2539 = vmatpush3.bf16.msra.mxu1 %v3347_v52 }
0x1680   :  { %2544 = vmatprep.subr.bf16.mxu0 %v2844_v2 }
0x173d   :  { %v1705_v3 = vpop.f32.mrb[32].mxu0  ;;  %v1746_v15 = vpop.f32.mrb[32].mxu1 }
0x173e   :  { %v1757_v22 = vrot.slane %v1746_v15, 2  ;;  %v1707_v4 = vpop.f32.mrb[33].mxu0  ;;  %v2526_v16 = vpop.f32.mrb[33].mxu1  ;;  %v1755_v0 = vrot.slane %v1705_v3, 2 }
0x173f   :  { %v1709_v20 = vpop.f32.mrb[34].mxu0  ;;  %v1749_v21 = vpop.f32.mrb[34].mxu1  ;;  %v1756_v1 = vrot.slane %v1707_v4, 2 }
0x1740   :  { %v1763_v5 = vadd.f32 %v1757_v22, %v1656_v17  ;;  %v1710_v23 = vpop.f32.mrb[35].mxu0  ;;  %v2527_v25 = vpop.f32.mrb[35].mxu1  ;;  %v1761_v35 = vadd.f32 %v1755_v0, %v1654_v34 }
0x1741   :  { %v1762_v7 = vadd.f32 %v1756_v1, %v1655_v6  ;;  %v1855_v6 = vld [vmem:[#allocation2 + $0x18] sm:$0xc0] }
0x1742   :  { %2761 = vtanh.f32 %v1763_v5  ;;  %v2292_v37 = vmul.f32 -1.442695, %v1761_v35  ;;  %v2294_v60 = vmul.f32 -1.442695, %v1763_v5  ;;  %v1857_v35 = vld [vmem:[#allocation2 + $0x28] sm:$0xc0] }
0x1743   :  { %v2293_v8 = vmul.f32 -1.442695, %v1762_v7 }
0x1744   :  { %2763 = vpow2.f32 %v2292_v37 }
0x174c   :  { %v2762_v26 = vpop.eup %2761 }
0x174d   :  { %1786 = vrot.lane.b32.xlu0 %v2762_v26, %s2849_s2 }
0x174e   :  { %v2764_v49 = vpop.eup %2763 }
0x174f   :  { %v1773_v52 = vadd.f32 1.0, %v2764_v49 }
0x1751   :  { %2765 = vrcp.f32 %v1773_v52 }
0x1752   :  { %2767 = vpow2.f32 %v2293_v8 }
0x175b   :  { %v2766_v54 = vpop.eup %2765 }
0x175c   :  { %v2768_v9 = vpop.eup %2767  ;;  %v1783_v63 = vmul.f32 %v2766_v54, %v3494_v19 }
0x175d   :  { %v1774_v13 = vadd.f32 1.0, %v2768_v9 }
0x175f   :  { %2769 = vrcp.f32 %v1774_v13 }
0x1769   :  { %v2770_v12 = vpop.eup %2769 }
0x176a   :  { %v1784_v31 = vmul.f32 %v2770_v12, %v3496_v33 }
0x17bf   :  { %v1787_v32 = vpop.permute.xlu0 %1786 }
0x17c0   :  { %v1789_v41 = vmul.f32 %v2766_v54, %v1787_v32 }
0x17c2   :  { %1791 = vrot.lane.b32.xlu1 %v1789_v41, %s2849_s2 }
0x1834   :  { %v1792_v14 = vpop.permute.xlu1 %1791 }
0x1835   :  { %v1794_v18 = vadd.f32 %v1792_v14, %v1783_v63  ;;  %v1795_v36 = vadd.f32 %v1792_v14, %v1784_v31 }
0x1837   :  { %2771 = vtanh.f32 %v1794_v18  ;;  %v1836_v24 = vrot.slane %v1795_v36, 6  ;;  %v1835_v33 = vrot.slane %v1794_v18, 6  ;;  %v1856_v18 = vld [vmem:[#allocation2 + $0x20] sm:$0xc0] }
0x1838   :  { %2773 = vtanh.f32 %v1795_v36 }
0x1839   :  { %2775 = vpow2.f32 %v2294_v60 }
0x1841   :  { %v2772_v28 = vpop.eup %2771 }
0x1842   :  { %v2774_v48 = vpop.eup %2773  ;;  %1800 = vrot.lane.b32.xlu0 %v2772_v28, %s2849_s2 }
0x1843   :  { %1802 = vrot.lane.b32.xlu1 %v2774_v48, %s2849_s2  ;;  %v2776_v62 = vpop.eup %2775 }
0x1844   :  { %v1775_v10 = vadd.f32 1.0, %v2776_v62 }
0x1846   :  { %2777 = vrcp.f32 %v1775_v10 }
0x1847   :  { %2586 = vrot.lane.b32.xlu1 %v3504_v59, %s2851_s27 }
0x184b   :  { %1839 = vrot.lane.b32.xlu1 %v1836_v24, %s2850_s3 }
0x184f   :  { %1849 = vrot.lane.b32.xlu1 %v1846_v27, %s2850_s3 }
0x1850   :  { %v2778_v61 = vpop.eup %2777 }
0x18b4   :  { %v1801_v11 = vpop.permute.xlu0 %1800 }
0x18b5   :  { %v1803_v43 = vpop.permute.xlu1 %1802 }
0x18b6   :  { %v1804_v38 = vsel %vm367_vm1, %v1801_v11, %v1803_v43  ;;  %v1808_v40 = vmul.f32 %v2778_v61, %v1803_v43  ;;  %v2615_v61 = vld [vmem:[%s3639_s5] sm:$0xff]   ;;  %v2616_v43 = vld [vmem:[%s3639_s5 + $0x8] sm:$0xff]  }
0x18b7   :  { %v1807_v57 = vmul.f32 %v2770_v12, %v1804_v38 }
0x18b8   :  { %v1815_v46 = vrot.slane %v1808_v40, 6  ;;  %1854 = vst.msk [vmem:[#allocation3 + $0x6] sm:$0xc0] %vm1013_vm7, %v1808_v40 }
0x18b9   :  { %v1814_v42 = vrot.slane %v1807_v57, 6  ;;  %v2587_v55 = vpop.permute.xlu1 %2586 }
0x18ba   :  { %v2589_v29 = vunpack.i.h.bf16 %v2587_v55  ;;  %v2588_v56 = vunpack.i.l.bf16 %v2587_v55 }
0x18bb   :  { %v2580_v51 = vpack.i.bf16 %v1815_v46, %v1814_v42 }
0x18bc   :  { %v1830_v3 = vsel %vm511_vm2, %v2588_v56, %v2589_v29 }
0x18bd   :  { %2581 = vrot.lane.b32.xlu0 %v2580_v51, %s2851_s27  ;;  %v1840_v58 = vpop.permute.xlu1 %1839 }
0x18c1   :  { %1837 = vrot.lane.b32.xlu0 %v1835_v33, %s2850_s3  ;;  %v1850_v47 = vpop.permute.xlu1 %1849 }
0x18c5   :  { %1847 = vrot.lane.b32.xlu0 %v1845_v53, %s2850_s3  ;;  %v1997_v53 = vld [vmem:[#allocation3] sm:$0xff] }
0x192f   :  { %v2582_v50 = vpop.permute.xlu0 %2581 }
0x1930   :  { %v2584_v44 = vunpack.i.h.bf16 %v2582_v50  ;;  %v2583_v45 = vunpack.i.l.bf16 %v2582_v50 }
0x1932   :  { %v1820_v19 = vsel %vm511_vm2, %v2583_v45, %v2584_v44 }
0x1933   :  { %v1832_v15 = vsel %vm3556_vm12, %v1820_v19, %v1830_v3  ;;  %v1838_v22 = vpop.permute.xlu0 %1837  ;;  %v2304_v19 = vld [vmem:[%s3641_s7] ss:$0 sm:$0xff] }
0x1934   :  { %v1858_v4 = vpack.c.bf16 %v1832_v15, %v1832_v15  ;;  %v1841_v17 = vsel %vm521_vm4, %v1838_v22, %v1840_v58 }
0x1936   :  { %2295 = vmatmul.mubr.msk.bf16.vlgmr.msra.gmra.mrb[36].mxu0 %vm367_vm1, %v1858_v4  ;;  %2541 = vmatmul.mubr.msk.bf16.vlgmr.msra.gmra.mrb[36].mxu1 %vm367_vm1, %v1858_v4  ;;  %vm2226_vm1 = vcmask 15368  }
0x1937   :  { %v1848_v16 = vpop.permute.xlu0 %1847  ;;  %2548 = vmatprep.mubr.msk.bf16.mxu0 %vm2845_vm0, %v2844_v2  ;;  %2545 = vmatpush3.bf16.msra.mxu0 %v2615_v61  ;;  %vm2215_vm0 = vcmask 7168  }
0x1938   :  { %v1851_v20 = vsel %vm521_vm4, %v1848_v16, %v1850_v47  ;;  %2546 = vmatprep.subr.bf16.mxu0 %v2844_v2  ;;  %v2300_v2 = vld [vmem:[%s3640_s6] ss:$0 sm:$0xff] }
0x1939   :  { %v1853_v21 = vsel %vm3556_vm12, %v1841_v17, %v1851_v20 }
0x193a   :  { %v1975_v5 = vrot.slane %v1853_v21, 2  ;;  %v2305_v21 = vld [vmem:[#allocation4] ss:$0 sm:$0xff] }
0x193b   :  { %2547 = vmatpush3.bf16.msra.mxu0 %v2616_v43 }
0x193c   :  { %1976 = vrot.lane.b32.xlu1 %v1975_v5, %s2849_s2 }
0x19ae   :  { %v1977_v60 = vpop.permute.xlu1 %1976 }
0x1a09   :  { %v1896_v23 = vpop.f32.mrb[36].mxu0  ;;  %v1937_v25 = vpop.f32.mrb[36].mxu1 }
0x1a0a   :  { %v1948_v26 = vrot.slane %v1937_v25, 2  ;;  %v1898_v0 = vpop.f32.mrb[37].mxu0  ;;  %v2542_v34 = vpop.f32.mrb[37].mxu1  ;;  %v1946_v1 = vrot.slane %v1896_v23, 2 }
0x1a0b   :  { %v1900_v37 = vpop.f32.mrb[38].mxu0  ;;  %v1940_v49 = vpop.f32.mrb[38].mxu1  ;;  %v1947_v14 = vrot.slane %v1898_v0, 2  ;;  %v2115_v0 = vld [vmem:[%s3635_s1] sm:$0xff]  ;;  %v2116_v34 = vld [vmem:[%s3635_s1 + $0x8] sm:$0xff] }
0x1a0c   :  { %v1954_v52 = vadd.f32 %v1948_v26, %v1857_v35  ;;  %v1901_v54 = vpop.f32.mrb[39].mxu0  ;;  %v2543_v32 = vpop.f32.mrb[39].mxu1  ;;  %v1952_v7 = vadd.f32 %v1946_v1, %v1855_v6  ;;  %v2098_v35 = vld [vmem:[%s3643_s9] sm:$0x3] }
0x1a0d   :  { %v1953_v36 = vadd.f32 %v1947_v14, %v1856_v18  ;;  %v2112_v49 = vrot.slane %v2098_v35, %v3058_v30 }
0x1a0e   :  { %2779 = vtanh.f32 %v1954_v52  ;;  %v2297_v8 = vmul.f32 -1.442695, %v1952_v7  ;;  %v2299_v40 = vmul.f32 -1.442695, %v1954_v52  ;;  %v2130_v52 = vrot.slane %v2098_v35, %v3068_v39  ;;  %v2306_v7 = vld [vmem:[%s3644_s10] ss:$0 sm:$0xff] }
0x1a0f   :  { %v2298_v28 = vmul.f32 -1.442695, %v1953_v36 }
0x1a10   :  { %2781 = vpow2.f32 %v2297_v8 }
0x1a18   :  { %v2780_v41 = vpop.eup %2779 }
0x1a19   :  { %1981 = vrot.lane.b32.xlu0 %v2780_v41, %s2849_s2 }
0x1a1a   :  { %v2782_v9 = vpop.eup %2781 }
0x1a1b   :  { %v1964_v13 = vadd.f32 1.0, %v2782_v9 }
0x1a1d   :  { %2783 = vrcp.f32 %v1964_v13 }
0x1a1e   :  { %2785 = vpow2.f32 %v2298_v28 }
0x1a27   :  { %v2784_v12 = vpop.eup %2783 }
0x1a28   :  { %v2786_v48 = vpop.eup %2785 }
0x1a29   :  { %v1965_v24 = vadd.f32 1.0, %v2786_v48 }
0x1a2b   :  { %2787 = vrcp.f32 %v1965_v24 }
0x1a35   :  { %v2788_v27 = vpop.eup %2787 }
0x1a36   :  { %v1979_v62 = vmul.f32 %v2788_v27, %v1977_v60 }
0x1a8b   :  { %v1982_v63 = vpop.permute.xlu0 %1981 }
0x1a8c   :  { %v1984_v31 = vmul.f32 %v2784_v12, %v1982_v63 }
0x1a8e   :  { %1986 = vrot.lane.b32.xlu0 %v1984_v31, %s2849_s2 }
0x1b00   :  { %v1987_v10 = vpop.permute.xlu0 %1986 }
0x1b01   :  { %v1989_v11 = vadd.f32 %v1987_v10, %v1979_v62 }
0x1b03   :  { %2789 = vtanh.f32 %v1989_v11 }
0x1b04   :  { %2791 = vpow2.f32 %v2299_v40 }
0x1b0d   :  { %v2790_v38 = vpop.eup %2789 }
0x1b0e   :  { %1992 = vrot.lane.b32.xlu1 %v2790_v38, %s2849_s2  ;;  %v2792_v57 = vpop.eup %2791 }
0x1b0f   :  { %v1966_v46 = vadd.f32 1.0, %v2792_v57 }
0x1b11   :  { %2793 = vrcp.f32 %v1966_v46 }
0x1b1b   :  { %v2794_v42 = vpop.eup %2793 }
0x1b80   :  { %v1993_v51 = vpop.permute.xlu1 %1992 }
0x1b81   :  { %v1995_v33 = vmul.f32 %v2794_v42, %v1993_v51  ;;  %v2307_v42 = vld [vmem:[%s3645_s11] ss:$0 sm:$0xff]  ;;  %s2852_s11 = smov 1  }
0x1b83   :  { %1996 = vst.msk [vmem:[#allocation3 + $0x8] sm:$0xc0] %vm1013_vm7, %v1995_v33  ;;  %v2308_v33 = vld [vmem:[%s3646_s12] ss:$0 sm:$0xff] }
0x1b8a   :  { %v1998_v55 = vld [vmem:[#allocation3 + $0x8] sm:$0xff] }
0x1b8b   :  { %v1999_v29 = vpack.c.bf16 %v1998_v55, %v1997_v53 }
0x1b8d   :  { %2549 = vmatmul.mubr.msk.bf16.vlgmr.msra.gmra.mrb[40].mxu0 %vm521_vm4, %v1999_v29 }
0x1c60   :  { %v2060_v56 = vpop.f32.mrb[40].mxu0 }
0x1c61   :  { %v2061_v50 = vadd.f32 %v2300_v2, %v2060_v56  ;;  %v2550_v59 = vpop.f32.mrb[41].mxu0  ;;  %v2309_v56 = vld [vmem:[%s3647_s13] ss:$0 sm:$0xff] }
0x1c62   :  { %v2063_v44 = vpop.f32.mrb[42].mxu0 }
0x1c63   :  { %vm2067_vm13 = vcmp.gt.f32.partialorder %v2061_v50, 0.0  ;;  %v2069_v45 = vmul.f32 0.01, %v2061_v50  ;;  %v2064_v58 = vadd.f32 %v2300_v2, %v2063_v44  ;;  %v2551_v3 = vpop.f32.mrb[43].mxu0 }
0x1c65   :  { %vm2068_vm14 = vcmp.gt.f32.partialorder %v2064_v58, 0.0  ;;  %v2070_v15 = vmul.f32 0.01, %v2064_v58  ;;  %v2071_v22 = vsel %vm2067_vm13, %v2061_v50, %v2069_v45 }
0x1c66   :  { %v2080_v4 = vmul.f32 %v2304_v19, %v2071_v22  ;;  %v2310_v22 = vld [vmem:[#allocation5] ss:$0 sm:$0xff] }
0x1c67   :  { %v2072_v47 = vsel %vm2068_vm14, %v2064_v58, %v2070_v15 }
0x1c68   :  { %v2083_v16 = vsel %vm2082_vm15, %v2080_v4, 0.0  ;;  %v2081_v17 = vmul.f32 %v2304_v19, %v2072_v47 }
0x1c69   :  { %2084 = vadd.xlane.f32.xlu0 %v2083_v16 }
0x1c6a   :  { %v2086_v20 = vsel %vm2082_vm15, %v2081_v17, 0.0 }
0x1c6b   :  { %2087 = vadd.xlane.f32.xlu1 %v2086_v20 }
0x1cf6   :  { %v2085_v5 = vpop.xlane.xlu0 %2084 }
0x1cf7   :  { %v2096_v23 = vadd.f32 %v2305_v21, %v2085_v5 }
0x1cf8   :  { %v2088_v25 = vpop.xlane.xlu1 %2087 }
0x1cf9   :  { %2216 = vst.msk [vmem:[%s3648_s15] sm:$0xff] %vm2215_vm0, %v2096_v23  ;;  %v2097_v26 = vadd.f32 %v2305_v21, %v2088_v25  ;;  %2101 = vperm.xlu0 %2577, %v2096_v23  }
0x1cfb   :  { %2217 = vst.msk [vmem:[%s3648_s15 + $0x8] sm:$0xff] %vm2215_vm0, %v2097_v26  ;;  %2106 = vperm.xlu1 %2590, %v2097_v26  }
0x1cfd   :  { %2119 = vperm.xlu0 %2577, %v2115_v0  }
0x1cff   :  { %2124 = vperm.xlu1 %2590, %v2116_v34  }
0x1d78   :  { %v2102_v37 = vpop.permute.xlu0 %2101 }
0x1d79   :  { %v2113_v41 = vmul.f32 %v2112_v49, %v2102_v37 }
0x1d7a   :  { %v2107_v54 = vpop.permute.xlu1 %2106 }
0x1d7b   :  { %v2114_v8 = vmul.f32 %v2112_v49, %v2107_v54 }
0x1d7c   :  { %v2120_v32 = vpop.permute.xlu0 %2119 }
0x1d7d   :  { %v2131_v1 = vmul.f32 %v2130_v52, %v2120_v32 }
0x1d7e   :  { %v2125_v6 = vpop.permute.xlu1 %2124 }
0x1d7f   :  { %v2133_v9 = vadd.f32 %v2131_v1, %v2113_v41  ;;  %v2132_v13 = vmul.f32 %v2130_v52, %v2125_v6 }
0x1d81   :  { %v2134_v12 = vadd.f32 %v2132_v13, %v2114_v8  ;;  %v2142_v63 = vadd.f32 %v2306_v7, %v2133_v9 }
0x1d83   :  { %v2144_v31 = vsel %vm2082_vm15, %v2142_v63, 0.0  ;;  %v2143_v14 = vadd.f32 %v2306_v7, %v2134_v12 }
0x1d84   :  { %2145 = vadd.xlane.f32.xlu0 %v2144_v31 }
0x1d85   :  { %v2147_v30 = vsel %vm2082_vm15, %v2143_v14, 0.0 }
0x1d86   :  { %2148 = vadd.xlane.f32.xlu1 %v2147_v30 }
0x1e11   :  { %v2146_v39 = vpop.xlane.xlu0 %2145 }
0x1e12   :  { %v2151_v18 = vmul.f32 0.0625, %v2146_v39 }
0x1e13   :  { %v2149_v36 = vpop.xlane.xlu1 %2148 }
0x1e14   :  { %v2153_v28 = vsub.f32 %v2142_v63, %v2151_v18  ;;  %v2152_v48 = vmul.f32 0.0625, %v2149_v36 }
0x1e16   :  { %v2154_v24 = vsub.f32 %v2143_v14, %v2152_v48  ;;  %v2155_v27 = vmul.f32 %v2153_v28, %v2153_v28 }
0x1e18   :  { %v2157_v60 = vsel %vm2082_vm15, %v2155_v27, 0.0  ;;  %v2156_v62 = vmul.f32 %v2154_v24, %v2154_v24 }
0x1e19   :  { %2158 = vadd.xlane.f32.xlu0 %v2157_v60 }
0x1e1a   :  { %v2160_v10 = vsel %vm2082_vm15, %v2156_v62, 0.0 }
0x1e1d   :  { %2161 = vadd.xlane.f32.xlu0 %v2160_v10 }
0x1ea6   :  { %v2159_v11 = vpop.xlane.xlu0 %2158 }
0x1ea7   :  { %v2163_v61 = vmul.f32 0.0625, %v2159_v11 }
0x1ea9   :  { %v2165_v43 = vadd.f32 1e-05, %v2163_v61 }
0x1eaa   :  { %v2162_v38 = vpop.xlane.xlu0 %2161 }
0x1eab   :  { %2795 = vrsqrt.f32 %v2165_v43  ;;  %v2164_v40 = vmul.f32 0.0625, %v2162_v38 }
0x1ead   :  { %v2166_v57 = vadd.f32 1e-05, %v2164_v40 }
0x1eaf   :  { %2797 = vrsqrt.f32 %v2166_v57 }
0x1eb5   :  { %v2796_v46 = vpop.eup %2795 }
0x1eb6   :  { %v2169_v51 = vmul.f32 %v2796_v46, %v2153_v28 }
0x1eb8   :  { %v2178_v53 = vmul.f32 %v2307_v42, %v2169_v51 }
0x1eb9   :  { %v2798_v55 = vpop.eup %2797 }
0x1eba   :  { %v2187_v29 = vadd.f32 %v2308_v33, %v2178_v53  ;;  %v2170_v2 = vmul.f32 %v2798_v55, %v2154_v24 }
0x1ebc   :  { %v2189_v50 = vmax.f32 %v2187_v29, 0.0  ;;  %v2179_v59 = vmul.f32 %v2307_v42, %v2170_v2 }
0x1ebe   :  { %v2198_v44 = vmul.f32 %v2309_v56, %v2189_v50  ;;  %v2188_v45 = vadd.f32 %v2308_v33, %v2179_v59 }
0x1ec0   :  { %v2200_v58 = vsel %vm2082_vm15, %v2198_v44, 0.0  ;;  %v2190_v3 = vmax.f32 %v2188_v45, 0.0 }
0x1ec1   :  { %2201 = vadd.xlane.f32.xlu1 %v2200_v58 }
0x1ec2   :  { %v2199_v19 = vmul.f32 %v2309_v56, %v2190_v3 }
0x1ec4   :  { %v2203_v15 = vsel %vm2082_vm15, %v2199_v19, 0.0 }
0x1ec5   :  { %2204 = vadd.xlane.f32.xlu0 %v2203_v15 }
0x1f4e   :  { %v2202_v4 = vpop.xlane.xlu1 %2201 }
0x1f4f   :  { %v2213_v47 = vadd.f32 %v2310_v22, %v2202_v4 }
0x1f51   :  { %2220 = vrot.lane.b32.xlu1 %v2213_v47, %s2852_s11 }
0x1f52   :  { %v2205_v16 = vpop.xlane.xlu0 %2204 }
0x1f53   :  { %v2214_v17 = vadd.f32 %v2310_v22, %v2205_v16 }
0x1f55   :  { %2222 = vrot.lane.b32.xlu0 %v2214_v17, %s2852_s11 }
0x1fc3   :  { %v2221_v20 = vpop.permute.xlu1 %2220 }
0x1fc4   :  { %2227 = vst.msk [vmem:[%s3648_s15] sm:$0xff] %vm2226_vm1, %v2221_v20 }
0x1fc7   :  { %v2223_v21 = vpop.permute.xlu0 %2222 }
0x1fc8   :  { %2228 = vst.msk [vmem:[%s3648_s15 + $0x8] sm:$0xff] %vm2226_vm1, %v2223_v21 }
0x1fc9   :  { %2233 = vsyncpa [#allocation7], 1 }

</bundles_post_ra>
